<compile_context>
chip_gen: v5e
topology: v5e:2x2
jax: 0.10.0
libtpu: 0.0.40
codegen_flags: <defaults>
</compile_context>

<pallas_src>
import jax
import jax.numpy as jnp
import numpy as np
from jax import lax
from jax.experimental import pallas as pl
from jax.experimental.pallas import tpu as pltpu

KERNEL_SIZE = 2
NUM_CHANNELS = [25, 25, 25, 30]
DROPOUT = 0.2          # unused at inference

GROUP = 4              # batch samples packed side-by-side on the lane axis
CP = 32                # per-sample padded channel width
LANES = GROUP * CP     # 128


def _round_up(x, m):
    return ((x + m - 1) // m) * m


# ---------------------------------------------------------------------------
# Fused kernel
# ---------------------------------------------------------------------------
def _make_kernel(layer_meta, t_tile, max_d):
    """One kernel body computing every TemporalBlock (unrolled over layers)."""

    def kernel(x_ref, w0_ref, w1_ref, b_ref, wd_ref, bd_ref, o_ref,
               stage_ref, halo_ref):
        # Zero the per-conv causal-history carry at the start of each sample
        # group (time-tile index 0).
        @pl.when(pl.program_id(1) == 0)
        def _():
            halo_ref[...] = jnp.zeros_like(halo_ref)

        def causal_conv(h_bf16, c, d):
            """relu(W_tap0 @ h[t-d] + W_tap1 @ h[t] + b).  h_bf16: (T, 128)."""
            # Stage this conv's input plus the d carried history rows in VMEM
            # so the shifted operand is a plain offset read (no roll / concat).
            stage_ref[pl.ds(max_d - d, d), :] = halo_ref[c, :d, :]
            stage_ref[pl.ds(max_d, t_tile), :] = h_bf16.astype(jnp.float32)
            # Carry the last d rows of this tile for the next time tile.
            halo_ref[c, :d, :] = stage_ref[pl.ds(max_d + t_tile - d, d), :]
            hs = stage_ref[pl.ds(max_d - d, t_tile), :].astype(jnp.bfloat16)
            y = (jnp.dot(hs, w0_ref[c], preferred_element_type=jnp.float32)
                 + jnp.dot(h_bf16, w1_ref[c], preferred_element_type=jnp.float32)
                 + b_ref[c])
            return jnp.maximum(y, 0.0)                        # (T, 128) f32

        h = x_ref[0]                                          # (T, 128) bf16
        out = None
        for li, meta in enumerate(layer_meta):
            d = meta["dilation"]
            # conv1 + chomp + relu   (dropout1 = identity at inference)
            h1 = causal_conv(h, 2 * li, d).astype(jnp.bfloat16)
            # conv2 + chomp + relu   (dropout2 = identity at inference)
            h2 = causal_conv(h1, 2 * li + 1, d)               # f32
            # residual (identity or 1x1 downsample conv)
            if meta["ds_index"] is None:
                res = h.astype(jnp.float32)
            else:
                dsi = meta["ds_index"]
                res = (jnp.dot(h, wd_ref[dsi],
                               preferred_element_type=jnp.float32)
                       + bd_ref[dsi])
            out = jnp.maximum(h2 + res, 0.0)                  # block output, f32
            h = out.astype(jnp.bfloat16)                      # carried bf16

        o_ref[0] = out.astype(o_ref.dtype)

    return kernel


def tcn_forward(x_ncl, params, *, t_tile=512):
    """Fused lane-packed Pallas TCN forward.  (N, C_in, L) f32 -> (N, C_last, L) f32."""
    N, c_in, L = x_ncl.shape
    c_last = params[-1]["c_out"]
    max_d = max(p["dilation"] for p in params)
    assert c_in <= CP and all(p["c_out"] <= CP for p in params), \
        "channel counts must fit the 32-lane per-sample pad"

    # Time-tile sizing: multiple of 8 sublanes, at least the largest dilation
    # (the halo carries exactly one previous tile), at most the padded length.
    t_tile = max(8, (min(int(t_tile), _round_up(L, 8)) // 8) * 8)
    assert t_tile % 8 == 0 and t_tile >= max_d
    L_pad = _round_up(L, t_tile)
    n_t = L_pad // t_tile

    G = -(-N // GROUP)                     # sample groups of 4 on the lane axis
    N_pad = G * GROUP

    # ---- pack (N, C_in, L) -> (G, L_pad, 128) bf16 --------------------------
    # TODO(synk): fuse this layout change (and the inverse below) into the
    # kernel via in-kernel XLU transposes to drop the extra HBM round trip.
    xp = jnp.pad(x_ncl, ((0, N_pad - N), (0, CP - c_in), (0, L_pad - L)))
    xp = (xp.reshape(G, GROUP, CP, L_pad)
            .transpose(0, 3, 1, 2)
            .reshape(G, L_pad, LANES)
            .astype(jnp.bfloat16))

    # ---- stacked, lane-packed weights ---------------------------------------
    W0s = jnp.stack([w for p in params for w in (p["W1_tap0"], p["W2_tap0"])])
    W1s = jnp.stack([w for p in params for w in (p["W1_tap1"], p["W2_tap1"])])
    Bs = jnp.stack([b for p in params for b in (p["B1"], p["B2"])])
    ds_layers = [i for i, p in enumerate(params) if p["has_downsample"]]
    if ds_layers:
        WDs = jnp.stack([params[i]["WD"] for i in ds_layers])
        BDs = jnp.stack([params[i]["BD"] for i in ds_layers])
    else:  # unused dummies (keep the kernel signature fixed)
        WDs = jnp.zeros((1, LANES, LANES), jnp.bfloat16)
        BDs = jnp.zeros((1, 1, LANES), jnp.float32)

    layer_meta = tuple(
        dict(dilation=p["dilation"],
             ds_index=(ds_layers.index(i) if p["has_downsample"] else None))
        for i, p in enumerate(params))
    n_conv = 2 * len(params)
    kernel = _make_kernel(layer_meta, t_tile, max_d)

    out = pl.pallas_call(
        kernel,
        out_shape=jax.ShapeDtypeStruct((G, L_pad, LANES), jnp.float32),
        grid=(G, n_t),
        in_specs=[
            pl.BlockSpec((1, t_tile, LANES), lambda g, t: (g, t, 0)),  # x tiles
            pl.BlockSpec(W0s.shape, lambda g, t: (0, 0, 0)),           # tap-0 W
            pl.BlockSpec(W1s.shape, lambda g, t: (0, 0, 0)),           # tap-1 W
            pl.BlockSpec(Bs.shape, lambda g, t: (0, 0, 0)),            # conv biases
            pl.BlockSpec(WDs.shape, lambda g, t: (0, 0, 0)),           # 1x1 downsample W
            pl.BlockSpec(BDs.shape, lambda g, t: (0, 0, 0)),           # 1x1 downsample b
        ],
        out_specs=pl.BlockSpec((1, t_tile, LANES), lambda g, t: (g, t, 0)),
        scratch_shapes=[
            pltpu.VMEM((max_d + t_tile, LANES), jnp.float32),  # conv staging + halo rows
            pltpu.VMEM((n_conv, max_d, LANES), jnp.float32),   # per-conv history carry
        ],
        compiler_params=pltpu.CompilerParams(
            dimension_semantics=("parallel", "arbitrary"),
            vmem_limit_bytes=48 * 1024 * 1024),
    )(xp, W0s, W1s, Bs, WDs, BDs)

    # ---- unpack (G, L_pad, 128) -> (N, c_last, L) ----------------------------
    out = (out.reshape(G, L_pad, GROUP, CP)
              .transpose(0, 2, 3, 1)
              .reshape(N_pad, CP, L_pad))
    return out[:N, :c_last, :L]


# ---------------------------------------------------------------------------
# Parameter construction (deterministic, synthetic).  weight_norm:
#     w = g * v / ||v||, norm per output channel (dim=0), as in PyTorch.
# ---------------------------------------------------------------------------
def _weight_norm(v, g):
    norm = jnp.sqrt(jnp.sum(v * v, axis=(1, 2), keepdims=True)) + 1e-12
    return g[:, None, None] * v / norm


def _lane_pack_matrix(w_io):
    """(c_in, c_out) -> (128, 128) block-diagonal bf16 (4 replicated copies)."""
    c_i, c_o = w_io.shape
    wp = jnp.zeros((CP, CP), jnp.float32).at[:c_i, :c_o].set(w_io)
    return jnp.kron(jnp.eye(GROUP, dtype=jnp.float32), wp).astype(jnp.bfloat16)


def _lane_pack_bias(b):
    """(c_out,) -> (1, 128) f32 (tiled over the 4 packed samples)."""
    bp = jnp.zeros((CP,), jnp.float32).at[:b.shape[0]].set(b)
    return jnp.tile(bp, GROUP).reshape(1, LANES)


def make_tcn_params(key, num_inputs, num_channels, kernel_size):
    assert kernel_size == 2, "tap folding below is hard-wired for kernel_size=2"
    params = []
    for i, c_out in enumerate(num_channels):
        c_in = num_inputs if i == 0 else num_channels[i - 1]
        dilation = 2 ** i
        key, *ks = jax.random.split(key, 9)

        v1 = 0.01 * jax.random.normal(ks[0], (c_out, c_in, kernel_size), jnp.float32)
        g1 = 1.0 + 0.1 * jax.random.normal(ks[1], (c_out,), jnp.float32)
        b1 = 0.05 * jax.random.normal(ks[2], (c_out,), jnp.float32)
        w1 = _weight_norm(v1, g1)                       # (O, I, K)

        v2 = 0.01 * jax.random.normal(ks[3], (c_out, c_out, kernel_size), jnp.float32)
        g2 = 1.0 + 0.1 * jax.random.normal(ks[4], (c_out,), jnp.float32)
        b2 = 0.05 * jax.random.normal(ks[5], (c_out,), jnp.float32)
        w2 = _weight_norm(v2, g2)

        has_ds = (c_in != c_out)
        if has_ds:
            wd = 0.01 * jax.random.normal(ks[6], (c_out, c_in), jnp.float32)
            bd = 0.05 * jax.random.normal(ks[7], (c_out,), jnp.float32)
        else:
            wd, bd = None, None

        entry = dict(
            dilation=dilation, has_downsample=has_ds, c_in=c_in, c_out=c_out,
            # lane-packed, block-diagonal bf16 matmul operands + f32 biases
            W1_tap0=_lane_pack_matrix(jnp.transpose(w1[:, :, 0])),   # hits x[t-d]
            W1_tap1=_lane_pack_matrix(jnp.transpose(w1[:, :, 1])),   # hits x[t]
            B1=_lane_pack_bias(b1),
            W2_tap0=_lane_pack_matrix(jnp.transpose(w2[:, :, 0])),
            W2_tap1=_lane_pack_matrix(jnp.transpose(w2[:, :, 1])),
            B2=_lane_pack_bias(b2),
            # raw f32 conv-style weights for the pure-JAX reference
            _w1=w1, _b1=b1, _w2=w2, _b2=b2, _wd=wd, _bd=bd,
        )
        if has_ds:
            entry["WD"] = _lane_pack_matrix(jnp.transpose(wd))
            entry["BD"] = _lane_pack_bias(bd)
        params.append(entry)
    return params


# ---------------------------------------------------------------------------
# Pure-JAX reference (mirrors PyTorch Conv1d + Chomp1d semantics), all f32.
# ---------------------------------------------------------------------------
def _ref_causal_conv(x_ncl, w_oik, b, dilation):
    pad = (w_oik.shape[-1] - 1) * dilation
    y = lax.conv_general_dilated(
        x_ncl, w_oik, window_strides=(1,), padding=[(pad, pad)],
        rhs_dilation=(dilation,), dimension_numbers=("NCH", "OIH", "NCH"))
    y = y[:, :, :-pad]                                  # Chomp1d
    return y + b[None, :, None]


def tcn_reference(x_ncl, params):
    h = x_ncl
    for p in params:
        d = p["dilation"]
        o = jnp.maximum(_ref_causal_conv(h, p["_w1"], p["_b1"], d), 0.0)
        o = jnp.maximum(_ref_causal_conv(o, p["_w2"], p["_b2"], d), 0.0)
        if p["has_downsample"]:
            res = jnp.einsum("ncl,oc->nol", h, p["_wd"]) + p["_bd"][None, :, None]
        else:
            res = h
        h = jnp.maximum(o + res, 0.0)
    return h


if __name__ == "__main__":
    key = jax.random.PRNGKey(0)
    k_x, k_p, k_x2 = jax.random.split(key, 3)

    C_IN = 4
    params = make_tcn_params(k_p, C_IN, NUM_CHANNELS, KERNEL_SIZE)

    # Case 1: the spec's small shape.  t_tile=8 forces a 2-step time grid so
    # the cross-tile halo carry (shifted reads) is actually exercised.
    N, L = 2, 16
    x = jax.random.normal(k_x, (N, C_IN, L), jnp.float32)   # PyTorch NCL layout
    out = jax.block_until_ready(tcn_forward(x, params, t_tile=8))
    ref = jax.block_until_ready(tcn_reference(x, params))
    assert out.shape == (N, NUM_CHANNELS[-1], L), out.shape
    # Tolerance sized for bf16 operands/activations (f32 accumulation) vs. an
    # all-f32 reference across 4 blocks / 8 convs; structural bugs give O(1) errors.
    np.testing.assert_allclose(np.asarray(out), np.asarray(ref),
                               rtol=5e-2, atol=5e-2)

    # Case 2: batch not a multiple of the lane-pack group and length not a
    # multiple of the time tile (exercises padding, 2 sample groups, 3 tiles).
    N2, L2 = 5, 20
    x2 = jax.random.normal(k_x2, (N2, C_IN, L2), jnp.float32)
    out2 = jax.block_until_ready(tcn_forward(x2, params, t_tile=8))
    ref2 = jax.block_until_ready(tcn_reference(x2, params))
    assert out2.shape == (N2, NUM_CHANNELS[-1], L2), out2.shape
    np.testing.assert_allclose(np.asarray(out2), np.asarray(ref2),
                               rtol=5e-2, atol=5e-2)

    print("KERNEL_OK")
</pallas_src>

<mosaic_0001>
module attributes {stable_mosaic.version = 11 : i64} {
  func.func @kernel(%arg0: i32, %arg1: i32, %arg2: memref<1x8x128xbf16, #tpu.memory_space<vmem>>, %arg3: memref<8x128x128xbf16, #tpu.memory_space<vmem>>, %arg4: memref<8x128x128xbf16, #tpu.memory_space<vmem>>, %arg5: memref<8x1x128xf32, #tpu.memory_space<vmem>>, %arg6: memref<2x128x128xbf16, #tpu.memory_space<vmem>>, %arg7: memref<2x1x128xf32, #tpu.memory_space<vmem>>, %arg8: memref<1x8x128xf32, #tpu.memory_space<vmem>>, %arg9: memref<16x128xf32, #tpu.memory_space<vmem>>, %arg10: memref<8x8x128xf32, #tpu.memory_space<vmem>>) attributes {dimension_semantics = [#tpu.dimension_semantics<parallel>, #tpu.dimension_semantics<arbitrary>], iteration_bounds = array<i64: 1, 2>, scalar_prefetch = 0 : i64, scratch_operands = 2 : i64, tpu.core_type = #tpu.core_type<tc>, window_params = [{transform_indices = @transform_0, window_bounds = array<i64: 1, 8, 128>}, {pipeline_mode = #tpu.pipeline_mode<synchronous>, transform_indices = @transform_1, window_bounds = array<i64: 8, 128, 128>}, {pipeline_mode = #tpu.pipeline_mode<synchronous>, transform_indices = @transform_2, window_bounds = array<i64: 8, 128, 128>}, {pipeline_mode = #tpu.pipeline_mode<synchronous>, transform_indices = @transform_3, window_bounds = array<i64: 8, 1, 128>}, {pipeline_mode = #tpu.pipeline_mode<synchronous>, transform_indices = @transform_4, window_bounds = array<i64: 2, 128, 128>}, {pipeline_mode = #tpu.pipeline_mode<synchronous>, transform_indices = @transform_5, window_bounds = array<i64: 2, 1, 128>}, {transform_indices = @transform_6, window_bounds = array<i64: 1, 8, 128>}]} {
    %c0_i32 = arith.constant 0 : i32
    %0 = arith.cmpi eq, %arg1, %c0_i32 : i32
    %1 = arith.extui %0 : i1 to i32
    %c0_i32_0 = arith.constant 0 : i32
    %2 = arith.cmpi ne, %1, %c0_i32_0 : i32
    scf.if %2 {
      %cst_220 = arith.constant 0.000000e+00 : f32
      %235 = vector.broadcast %cst_220 : f32 to vector<8x8x128xf32>
      %c0_221 = arith.constant 0 : index
      %c0_222 = arith.constant 0 : index
      %c0_223 = arith.constant 0 : index
      %236 = vector.load %arg10[%c0_221, %c0_222, %c0_223] : memref<8x8x128xf32, #tpu.memory_space<vmem>>, vector<8x8x128xf32>
      tpu.vector_store %arg10[%c0_221, %c0_222, %c0_223], %235 {strides = array<i32>} : memref<8x8x128xf32, #tpu.memory_space<vmem>>, vector<8x8x128xf32>,
    } else {
    }
    %c0 = arith.constant 0 : index
    %c0_1 = arith.constant 0 : index
    %c0_2 = arith.constant 0 : index
    %3 = vector.load %arg2[%c0, %c0_1, %c0_2] : memref<1x8x128xbf16, #tpu.memory_space<vmem>>, vector<1x8x128xbf16>
    %4 = vector.shape_cast %3 : vector<1x8x128xbf16> to vector<8x128xbf16>
    %c0_3 = arith.constant 0 : index
    %c0_4 = arith.constant 0 : index
    %c0_5 = arith.constant 0 : index
    %5 = vector.load %arg10[%c0_3, %c0_4, %c0_5] : memref<8x8x128xf32, #tpu.memory_space<vmem>>, vector<1x1x128xf32>
    %6 = vector.shape_cast %5 : vector<1x1x128xf32> to vector<1x128xf32>
    %c7 = arith.constant 7 : index
    %c0_6 = arith.constant 0 : index
    %7 = vector.load %arg9[%c7, %c0_6] : memref<16x128xf32, #tpu.memory_space<vmem>>, vector<1x128xf32>
    tpu.vector_store %arg9[%c7, %c0_6], %6 {strides = array<i32>} : memref<16x128xf32, #tpu.memory_space<vmem>>, vector<1x128xf32>,
    %8 = arith.extf %4 : vector<8x128xbf16> to vector<8x128xf32>
    %c8 = arith.constant 8 : index
    %c0_7 = arith.constant 0 : index
    %9 = vector.load %arg9[%c8, %c0_7] : memref<16x128xf32, #tpu.memory_space<vmem>>, vector<8x128xf32>
    tpu.vector_store %arg9[%c8, %c0_7], %8 {strides = array<i32>} : memref<16x128xf32, #tpu.memory_space<vmem>>, vector<8x128xf32>,
    %c15 = arith.constant 15 : index
    %c0_8 = arith.constant 0 : index
    %10 = vector.load %arg9[%c15, %c0_8] : memref<16x128xf32, #tpu.memory_space<vmem>>, vector<1x128xf32>
    %c0_9 = arith.constant 0 : index
    %c0_10 = arith.constant 0 : index
    %c0_11 = arith.constant 0 : index
    %11 = vector.load %arg10[%c0_9, %c0_10, %c0_11] : memref<8x8x128xf32, #tpu.memory_space<vmem>>, vector<1x1x128xf32>
    %12 = vector.shape_cast %11 : vector<1x1x128xf32> to vector<1x128xf32>
    %13 = vector.shape_cast %10 : vector<1x128xf32> to vector<1x1x128xf32>
    tpu.vector_store %arg10[%c0_9, %c0_10, %c0_11], %13 {strides = array<i32>} : memref<8x8x128xf32, #tpu.memory_space<vmem>>, vector<1x1x128xf32>,
    %c7_12 = arith.constant 7 : index
    %c0_13 = arith.constant 0 : index
    %14 = vector.load %arg9[%c7_12, %c0_13] : memref<16x128xf32, #tpu.memory_space<vmem>>, vector<8x128xf32>
    %15 = arith.truncf %14 : vector<8x128xf32> to vector<8x128xbf16>
    %c0_14 = arith.constant 0 : index
    %c0_15 = arith.constant 0 : index
    %c0_16 = arith.constant 0 : index
    %16 = vector.load %arg3[%c0_14, %c0_15, %c0_16] : memref<8x128x128xbf16, #tpu.memory_space<vmem>>, vector<1x128x128xbf16>
    %17 = vector.shape_cast %16 : vector<1x128x128xbf16> to vector<128x128xbf16>
    %cst = arith.constant dense<0.000000e+00> : vector<8x128xf32>
    %18 = tpu.matmul %15, %17, %cst {dimension_numbers = #tpu.dot_dimension_numbers<[1], [0], [0], [1], [0, 0, 1, 1], [], []>} : vector<8x128xbf16>, vector<128x128xbf16>, vector<8x128xf32> -> vector<8x128xf32>
    %c0_17 = arith.constant 0 : index
    %c0_18 = arith.constant 0 : index
    %c0_19 = arith.constant 0 : index
    %19 = vector.load %arg4[%c0_17, %c0_18, %c0_19] : memref<8x128x128xbf16, #tpu.memory_space<vmem>>, vector<1x128x128xbf16>
    %20 = vector.shape_cast %19 : vector<1x128x128xbf16> to vector<128x128xbf16>
    %cst_20 = arith.constant dense<0.000000e+00> : vector<8x128xf32>
    %21 = tpu.matmul %4, %20, %cst_20 {dimension_numbers = #tpu.dot_dimension_numbers<[1], [0], [0], [1], [0, 0, 1, 1], [], []>} : vector<8x128xbf16>, vector<128x128xbf16>, vector<8x128xf32> -> vector<8x128xf32>
    %22 = arith.addf %18, %21 : vector<8x128xf32>
    %c0_21 = arith.constant 0 : index
    %c0_22 = arith.constant 0 : index
    %c0_23 = arith.constant 0 : index
    %23 = vector.load %arg5[%c0_21, %c0_22, %c0_23] : memref<8x1x128xf32, #tpu.memory_space<vmem>>, vector<1x1x128xf32>
    %24 = vector.shape_cast %23 : vector<1x1x128xf32> to vector<1x128xf32>
    %25 = vector.broadcast %24 : vector<1x128xf32> to vector<8x128xf32>
    %26 = arith.addf %22, %25 : vector<8x128xf32>
    %cst_24 = arith.constant 0.000000e+00 : f32
    %27 = vector.broadcast %cst_24 : f32 to vector<8x128xf32>
    %28 = arith.maximumf %26, %27 : vector<8x128xf32>
    %29 = arith.truncf %28 : vector<8x128xf32> to vector<8x128xbf16>
    %c1 = arith.constant 1 : index
    %c0_25 = arith.constant 0 : index
    %c0_26 = arith.constant 0 : index
    %30 = vector.load %arg10[%c1, %c0_25, %c0_26] : memref<8x8x128xf32, #tpu.memory_space<vmem>>, vector<1x1x128xf32>
    %31 = vector.shape_cast %30 : vector<1x1x128xf32> to vector<1x128xf32>
    %c7_27 = arith.constant 7 : index
    %c0_28 = arith.constant 0 : index
    %32 = vector.load %arg9[%c7_27, %c0_28] : memref<16x128xf32, #tpu.memory_space<vmem>>, vector<1x128xf32>
    tpu.vector_store %arg9[%c7_27, %c0_28], %31 {strides = array<i32>} : memref<16x128xf32, #tpu.memory_space<vmem>>, vector<1x128xf32>,
    %33 = arith.extf %29 : vector<8x128xbf16> to vector<8x128xf32>
    %c8_29 = arith.constant 8 : index
    %c0_30 = arith.constant 0 : index
    %34 = vector.load %arg9[%c8_29, %c0_30] : memref<16x128xf32, #tpu.memory_space<vmem>>, vector<8x128xf32>
    tpu.vector_store %arg9[%c8_29, %c0_30], %33 {strides = array<i32>} : memref<16x128xf32, #tpu.memory_space<vmem>>, vector<8x128xf32>,
    %c15_31 = arith.constant 15 : index
    %c0_32 = arith.constant 0 : index
    %35 = vector.load %arg9[%c15_31, %c0_32] : memref<16x128xf32, #tpu.memory_space<vmem>>, vector<1x128xf32>
    %c1_33 = arith.constant 1 : index
    %c0_34 = arith.constant 0 : index
    %c0_35 = arith.constant 0 : index
    %36 = vector.load %arg10[%c1_33, %c0_34, %c0_35] : memref<8x8x128xf32, #tpu.memory_space<vmem>>, vector<1x1x128xf32>
    %37 = vector.shape_cast %36 : vector<1x1x128xf32> to vector<1x128xf32>
    %38 = vector.shape_cast %35 : vector<1x128xf32> to vector<1x1x128xf32>
    tpu.vector_store %arg10[%c1_33, %c0_34, %c0_35], %38 {strides = array<i32>} : memref<8x8x128xf32, #tpu.memory_space<vmem>>, vector<1x1x128xf32>,
    %c7_36 = arith.constant 7 : index
    %c0_37 = arith.constant 0 : index
    %39 = vector.load %arg9[%c7_36, %c0_37] : memref<16x128xf32, #tpu.memory_space<vmem>>, vector<8x128xf32>
    %40 = arith.truncf %39 : vector<8x128xf32> to vector<8x128xbf16>
    %c1_38 = arith.constant 1 : index
    %c0_39 = arith.constant 0 : index
    %c0_40 = arith.constant 0 : index
    %41 = vector.load %arg3[%c1_38, %c0_39, %c0_40] : memref<8x128x128xbf16, #tpu.memory_space<vmem>>, vector<1x128x128xbf16>
    %42 = vector.shape_cast %41 : vector<1x128x128xbf16> to vector<128x128xbf16>
    %cst_41 = arith.constant dense<0.000000e+00> : vector<8x128xf32>
    %43 = tpu.matmul %40, %42, %cst_41 {dimension_numbers = #tpu.dot_dimension_numbers<[1], [0], [0], [1], [0, 0, 1, 1], [], []>} : vector<8x128xbf16>, vector<128x128xbf16>, vector<8x128xf32> -> vector<8x128xf32>
    %c1_42 = arith.constant 1 : index
    %c0_43 = arith.constant 0 : index
    %c0_44 = arith.constant 0 : index
    %44 = vector.load %arg4[%c1_42, %c0_43, %c0_44] : memref<8x128x128xbf16, #tpu.memory_space<vmem>>, vector<1x128x128xbf16>
    %45 = vector.shape_cast %44 : vector<1x128x128xbf16> to vector<128x128xbf16>
    %cst_45 = arith.constant dense<0.000000e+00> : vector<8x128xf32>
    %46 = tpu.matmul %29, %45, %cst_45 {dimension_numbers = #tpu.dot_dimension_numbers<[1], [0], [0], [1], [0, 0, 1, 1], [], []>} : vector<8x128xbf16>, vector<128x128xbf16>, vector<8x128xf32> -> vector<8x128xf32>
    %47 = arith.addf %43, %46 : vector<8x128xf32>
    %c1_46 = arith.constant 1 : index
    %c0_47 = arith.constant 0 : index
    %c0_48 = arith.constant 0 : index
    %48 = vector.load %arg5[%c1_46, %c0_47, %c0_48] : memref<8x1x128xf32, #tpu.memory_space<vmem>>, vector<1x1x128xf32>
    %49 = vector.shape_cast %48 : vector<1x1x128xf32> to vector<1x128xf32>
    %50 = vector.broadcast %49 : vector<1x128xf32> to vector<8x128xf32>
    %51 = arith.addf %47, %50 : vector<8x128xf32>
    %cst_49 = arith.constant 0.000000e+00 : f32
    %52 = vector.broadcast %cst_49 : f32 to vector<8x128xf32>
    %53 = arith.maximumf %51, %52 : vector<8x128xf32>
    %c0_50 = arith.constant 0 : index
    %c0_51 = arith.constant 0 : index
    %c0_52 = arith.constant 0 : index
    %54 = vector.load %arg6[%c0_50, %c0_51, %c0_52] : memref<2x128x128xbf16, #tpu.memory_space<vmem>>, vector<1x128x128xbf16>
    %55 = vector.shape_cast %54 : vector<1x128x128xbf16> to vector<128x128xbf16>
    %cst_53 = arith.constant dense<0.000000e+00> : vector<8x128xf32>
    %56 = tpu.matmul %4, %55, %cst_53 {dimension_numbers = #tpu.dot_dimension_numbers<[1], [0], [0], [1], [0, 0, 1, 1], [], []>} : vector<8x128xbf16>, vector<128x128xbf16>, vector<8x128xf32> -> vector<8x128xf32>
    %c0_54 = arith.constant 0 : index
    %c0_55 = arith.constant 0 : index
    %c0_56 = arith.constant 0 : index
    %57 = vector.load %arg7[%c0_54, %c0_55, %c0_56] : memref<2x1x128xf32, #tpu.memory_space<vmem>>, vector<1x1x128xf32>
    %58 = vector.shape_cast %57 : vector<1x1x128xf32> to vector<1x128xf32>
    %59 = vector.broadcast %58 : vector<1x128xf32> to vector<8x128xf32>
    %60 = arith.addf %56, %59 : vector<8x128xf32>
    %61 = arith.addf %53, %60 : vector<8x128xf32>
    %cst_57 = arith.constant 0.000000e+00 : f32
    %62 = vector.broadcast %cst_57 : f32 to vector<8x128xf32>
    %63 = arith.maximumf %61, %62 : vector<8x128xf32>
    %64 = arith.truncf %63 : vector<8x128xf32> to vector<8x128xbf16>
    %c2 = arith.constant 2 : index
    %c0_58 = arith.constant 0 : index
    %c0_59 = arith.constant 0 : index
    %65 = vector.load %arg10[%c2, %c0_58, %c0_59] : memref<8x8x128xf32, #tpu.memory_space<vmem>>, vector<1x2x128xf32>
    %66 = vector.shape_cast %65 : vector<1x2x128xf32> to vector<2x128xf32>
    %c6 = arith.constant 6 : index
    %c0_60 = arith.constant 0 : index
    %67 = vector.load %arg9[%c6, %c0_60] : memref<16x128xf32, #tpu.memory_space<vmem>>, vector<2x128xf32>
    tpu.vector_store %arg9[%c6, %c0_60], %66 {strides = array<i32>} : memref<16x128xf32, #tpu.memory_space<vmem>>, vector<2x128xf32>,
    %68 = arith.extf %64 : vector<8x128xbf16> to vector<8x128xf32>
    %c8_61 = arith.constant 8 : index
    %c0_62 = arith.constant 0 : index
    %69 = vector.load %arg9[%c8_61, %c0_62] : memref<16x128xf32, #tpu.memory_space<vmem>>, vector<8x128xf32>
    tpu.vector_store %arg9[%c8_61, %c0_62], %68 {strides = array<i32>} : memref<16x128xf32, #tpu.memory_space<vmem>>, vector<8x128xf32>,
    %c14 = arith.constant 14 : index
    %c0_63 = arith.constant 0 : index
    %70 = vector.load %arg9[%c14, %c0_63] : memref<16x128xf32, #tpu.memory_space<vmem>>, vector<2x128xf32>
    %c2_64 = arith.constant 2 : index
    %c0_65 = arith.constant 0 : index
    %c0_66 = arith.constant 0 : index
    %71 = vector.load %arg10[%c2_64, %c0_65, %c0_66] : memref<8x8x128xf32, #tpu.memory_space<vmem>>, vector<1x2x128xf32>
    %72 = vector.shape_cast %71 : vector<1x2x128xf32> to vector<2x128xf32>
    %73 = vector.shape_cast %70 : vector<2x128xf32> to vector<1x2x128xf32>
    tpu.vector_store %arg10[%c2_64, %c0_65, %c0_66], %73 {strides = array<i32>} : memref<8x8x128xf32, #tpu.memory_space<vmem>>, vector<1x2x128xf32>,
    %c6_67 = arith.constant 6 : index
    %c0_68 = arith.constant 0 : index
    %74 = vector.load %arg9[%c6_67, %c0_68] : memref<16x128xf32, #tpu.memory_space<vmem>>, vector<8x128xf32>
    %75 = arith.truncf %74 : vector<8x128xf32> to vector<8x128xbf16>
    %c2_69 = arith.constant 2 : index
    %c0_70 = arith.constant 0 : index
    %c0_71 = arith.constant 0 : index
    %76 = vector.load %arg3[%c2_69, %c0_70, %c0_71] : memref<8x128x128xbf16, #tpu.memory_space<vmem>>, vector<1x128x128xbf16>
    %77 = vector.shape_cast %76 : vector<1x128x128xbf16> to vector<128x128xbf16>
    %cst_72 = arith.constant dense<0.000000e+00> : vector<8x128xf32>
    %78 = tpu.matmul %75, %77, %cst_72 {dimension_numbers = #tpu.dot_dimension_numbers<[1], [0], [0], [1], [0, 0, 1, 1], [], []>} : vector<8x128xbf16>, vector<128x128xbf16>, vector<8x128xf32> -> vector<8x128xf32>
    %c2_73 = arith.constant 2 : index
    %c0_74 = arith.constant 0 : index
    %c0_75 = arith.constant 0 : index
    %79 = vector.load %arg4[%c2_73, %c0_74, %c0_75] : memref<8x128x128xbf16, #tpu.memory_space<vmem>>, vector<1x128x128xbf16>
    %80 = vector.shape_cast %79 : vector<1x128x128xbf16> to vector<128x128xbf16>
    %cst_76 = arith.constant dense<0.000000e+00> : vector<8x128xf32>
    %81 = tpu.matmul %64, %80, %cst_76 {dimension_numbers = #tpu.dot_dimension_numbers<[1], [0], [0], [1], [0, 0, 1, 1], [], []>} : vector<8x128xbf16>, vector<128x128xbf16>, vector<8x128xf32> -> vector<8x128xf32>
    %82 = arith.addf %78, %81 : vector<8x128xf32>
    %c2_77 = arith.constant 2 : index
    %c0_78 = arith.constant 0 : index
    %c0_79 = arith.constant 0 : index
    %83 = vector.load %arg5[%c2_77, %c0_78, %c0_79] : memref<8x1x128xf32, #tpu.memory_space<vmem>>, vector<1x1x128xf32>
    %84 = vector.shape_cast %83 : vector<1x1x128xf32> to vector<1x128xf32>
    %85 = vector.broadcast %84 : vector<1x128xf32> to vector<8x128xf32>
    %86 = arith.addf %82, %85 : vector<8x128xf32>
    %cst_80 = arith.constant 0.000000e+00 : f32
    %87 = vector.broadcast %cst_80 : f32 to vector<8x128xf32>
    %88 = arith.maximumf %86, %87 : vector<8x128xf32>
    %89 = arith.truncf %88 : vector<8x128xf32> to vector<8x128xbf16>
    %c3 = arith.constant 3 : index
    %c0_81 = arith.constant 0 : index
    %c0_82 = arith.constant 0 : index
    %90 = vector.load %arg10[%c3, %c0_81, %c0_82] : memref<8x8x128xf32, #tpu.memory_space<vmem>>, vector<1x2x128xf32>
    %91 = vector.shape_cast %90 : vector<1x2x128xf32> to vector<2x128xf32>
    %c6_83 = arith.constant 6 : index
    %c0_84 = arith.constant 0 : index
    %92 = vector.load %arg9[%c6_83, %c0_84] : memref<16x128xf32, #tpu.memory_space<vmem>>, vector<2x128xf32>
    tpu.vector_store %arg9[%c6_83, %c0_84], %91 {strides = array<i32>} : memref<16x128xf32, #tpu.memory_space<vmem>>, vector<2x128xf32>,
    %93 = arith.extf %89 : vector<8x128xbf16> to vector<8x128xf32>
    %c8_85 = arith.constant 8 : index
    %c0_86 = arith.constant 0 : index
    %94 = vector.load %arg9[%c8_85, %c0_86] : memref<16x128xf32, #tpu.memory_space<vmem>>, vector<8x128xf32>
    tpu.vector_store %arg9[%c8_85, %c0_86], %93 {strides = array<i32>} : memref<16x128xf32, #tpu.memory_space<vmem>>, vector<8x128xf32>,
    %c14_87 = arith.constant 14 : index
    %c0_88 = arith.constant 0 : index
    %95 = vector.load %arg9[%c14_87, %c0_88] : memref<16x128xf32, #tpu.memory_space<vmem>>, vector<2x128xf32>
    %c3_89 = arith.constant 3 : index
    %c0_90 = arith.constant 0 : index
    %c0_91 = arith.constant 0 : index
    %96 = vector.load %arg10[%c3_89, %c0_90, %c0_91] : memref<8x8x128xf32, #tpu.memory_space<vmem>>, vector<1x2x128xf32>
    %97 = vector.shape_cast %96 : vector<1x2x128xf32> to vector<2x128xf32>
    %98 = vector.shape_cast %95 : vector<2x128xf32> to vector<1x2x128xf32>
    tpu.vector_store %arg10[%c3_89, %c0_90, %c0_91], %98 {strides = array<i32>} : memref<8x8x128xf32, #tpu.memory_space<vmem>>, vector<1x2x128xf32>,
    %c6_92 = arith.constant 6 : index
    %c0_93 = arith.constant 0 : index
    %99 = vector.load %arg9[%c6_92, %c0_93] : memref<16x128xf32, #tpu.memory_space<vmem>>, vector<8x128xf32>
    %100 = arith.truncf %99 : vector<8x128xf32> to vector<8x128xbf16>
    %c3_94 = arith.constant 3 : index
    %c0_95 = arith.constant 0 : index
    %c0_96 = arith.constant 0 : index
    %101 = vector.load %arg3[%c3_94, %c0_95, %c0_96] : memref<8x128x128xbf16, #tpu.memory_space<vmem>>, vector<1x128x128xbf16>
    %102 = vector.shape_cast %101 : vector<1x128x128xbf16> to vector<128x128xbf16>
    %cst_97 = arith.constant dense<0.000000e+00> : vector<8x128xf32>
    %103 = tpu.matmul %100, %102, %cst_97 {dimension_numbers = #tpu.dot_dimension_numbers<[1], [0], [0], [1], [0, 0, 1, 1], [], []>} : vector<8x128xbf16>, vector<128x128xbf16>, vector<8x128xf32> -> vector<8x128xf32>
    %c3_98 = arith.constant 3 : index
    %c0_99 = arith.constant 0 : index
    %c0_100 = arith.constant 0 : index
    %104 = vector.load %arg4[%c3_98, %c0_99, %c0_100] : memref<8x128x128xbf16, #tpu.memory_space<vmem>>, vector<1x128x128xbf16>
    %105 = vector.shape_cast %104 : vector<1x128x128xbf16> to vector<128x128xbf16>
    %cst_101 = arith.constant dense<0.000000e+00> : vector<8x128xf32>
    %106 = tpu.matmul %89, %105, %cst_101 {dimension_numbers = #tpu.dot_dimension_numbers<[1], [0], [0], [1], [0, 0, 1, 1], [], []>} : vector<8x128xbf16>, vector<128x128xbf16>, vector<8x128xf32> -> vector<8x128xf32>
    %107 = arith.addf %103, %106 : vector<8x128xf32>
    %c3_102 = arith.constant 3 : index
    %c0_103 = arith.constant 0 : index
    %c0_104 = arith.constant 0 : index
    %108 = vector.load %arg5[%c3_102, %c0_103, %c0_104] : memref<8x1x128xf32, #tpu.memory_space<vmem>>, vector<1x1x128xf32>
    %109 = vector.shape_cast %108 : vector<1x1x128xf32> to vector<1x128xf32>
    %110 = vector.broadcast %109 : vector<1x128xf32> to vector<8x128xf32>
    %111 = arith.addf %107, %110 : vector<8x128xf32>
    %cst_105 = arith.constant 0.000000e+00 : f32
    %112 = vector.broadcast %cst_105 : f32 to vector<8x128xf32>
    %113 = arith.maximumf %111, %112 : vector<8x128xf32>
    %114 = arith.extf %64 : vector<8x128xbf16> to vector<8x128xf32>
    %115 = arith.addf %113, %114 : vector<8x128xf32>
    %cst_106 = arith.constant 0.000000e+00 : f32
    %116 = vector.broadcast %cst_106 : f32 to vector<8x128xf32>
    %117 = arith.maximumf %115, %116 : vector<8x128xf32>
    %118 = arith.truncf %117 : vector<8x128xf32> to vector<8x128xbf16>
    %c4 = arith.constant 4 : index
    %c0_107 = arith.constant 0 : index
    %c0_108 = arith.constant 0 : index
    %119 = vector.load %arg10[%c4, %c0_107, %c0_108] : memref<8x8x128xf32, #tpu.memory_space<vmem>>, vector<1x4x128xf32>
    %120 = vector.shape_cast %119 : vector<1x4x128xf32> to vector<4x128xf32>
    %c4_109 = arith.constant 4 : index
    %c0_110 = arith.constant 0 : index
    %121 = vector.load %arg9[%c4_109, %c0_110] : memref<16x128xf32, #tpu.memory_space<vmem>>, vector<4x128xf32>
    tpu.vector_store %arg9[%c4_109, %c0_110], %120 {strides = array<i32>} : memref<16x128xf32, #tpu.memory_space<vmem>>, vector<4x128xf32>,
    %122 = arith.extf %118 : vector<8x128xbf16> to vector<8x128xf32>
    %c8_111 = arith.constant 8 : index
    %c0_112 = arith.constant 0 : index
    %123 = vector.load %arg9[%c8_111, %c0_112] : memref<16x128xf32, #tpu.memory_space<vmem>>, vector<8x128xf32>
    tpu.vector_store %arg9[%c8_111, %c0_112], %122 {strides = array<i32>} : memref<16x128xf32, #tpu.memory_space<vmem>>, vector<8x128xf32>,
    %c12 = arith.constant 12 : index
    %c0_113 = arith.constant 0 : index
    %124 = vector.load %arg9[%c12, %c0_113] : memref<16x128xf32, #tpu.memory_space<vmem>>, vector<4x128xf32>
    %c4_114 = arith.constant 4 : index
    %c0_115 = arith.constant 0 : index
    %c0_116 = arith.constant 0 : index
    %125 = vector.load %arg10[%c4_114, %c0_115, %c0_116] : memref<8x8x128xf32, #tpu.memory_space<vmem>>, vector<1x4x128xf32>
    %126 = vector.shape_cast %125 : vector<1x4x128xf32> to vector<4x128xf32>
    %127 = vector.shape_cast %124 : vector<4x128xf32> to vector<1x4x128xf32>
    tpu.vector_store %arg10[%c4_114, %c0_115, %c0_116], %127 {strides = array<i32>} : memref<8x8x128xf32, #tpu.memory_space<vmem>>, vector<1x4x128xf32>,
    %c4_117 = arith.constant 4 : index
    %c0_118 = arith.constant 0 : index
    %128 = vector.load %arg9[%c4_117, %c0_118] : memref<16x128xf32, #tpu.memory_space<vmem>>, vector<8x128xf32>
    %129 = arith.truncf %128 : vector<8x128xf32> to vector<8x128xbf16>
    %c4_119 = arith.constant 4 : index
    %c0_120 = arith.constant 0 : index
    %c0_121 = arith.constant 0 : index
    %130 = vector.load %arg3[%c4_119, %c0_120, %c0_121] : memref<8x128x128xbf16, #tpu.memory_space<vmem>>, vector<1x128x128xbf16>
    %131 = vector.shape_cast %130 : vector<1x128x128xbf16> to vector<128x128xbf16>
    %cst_122 = arith.constant dense<0.000000e+00> : vector<8x128xf32>
    %132 = tpu.matmul %129, %131, %cst_122 {dimension_numbers = #tpu.dot_dimension_numbers<[1], [0], [0], [1], [0, 0, 1, 1], [], []>} : vector<8x128xbf16>, vector<128x128xbf16>, vector<8x128xf32> -> vector<8x128xf32>
    %c4_123 = arith.constant 4 : index
    %c0_124 = arith.constant 0 : index
    %c0_125 = arith.constant 0 : index
    %133 = vector.load %arg4[%c4_123, %c0_124, %c0_125] : memref<8x128x128xbf16, #tpu.memory_space<vmem>>, vector<1x128x128xbf16>
    %134 = vector.shape_cast %133 : vector<1x128x128xbf16> to vector<128x128xbf16>
    %cst_126 = arith.constant dense<0.000000e+00> : vector<8x128xf32>
    %135 = tpu.matmul %118, %134, %cst_126 {dimension_numbers = #tpu.dot_dimension_numbers<[1], [0], [0], [1], [0, 0, 1, 1], [], []>} : vector<8x128xbf16>, vector<128x128xbf16>, vector<8x128xf32> -> vector<8x128xf32>
    %136 = arith.addf %132, %135 : vector<8x128xf32>
    %c4_127 = arith.constant 4 : index
    %c0_128 = arith.constant 0 : index
    %c0_129 = arith.constant 0 : index
    %137 = vector.load %arg5[%c4_127, %c0_128, %c0_129] : memref<8x1x128xf32, #tpu.memory_space<vmem>>, vector<1x1x128xf32>
    %138 = vector.shape_cast %137 : vector<1x1x128xf32> to vector<1x128xf32>
    %139 = vector.broadcast %138 : vector<1x128xf32> to vector<8x128xf32>
    %140 = arith.addf %136, %139 : vector<8x128xf32>
    %cst_130 = arith.constant 0.000000e+00 : f32
    %141 = vector.broadcast %cst_130 : f32 to vector<8x128xf32>
    %142 = arith.maximumf %140, %141 : vector<8x128xf32>
    %143 = arith.truncf %142 : vector<8x128xf32> to vector<8x128xbf16>
    %c5 = arith.constant 5 : index
    %c0_131 = arith.constant 0 : index
    %c0_132 = arith.constant 0 : index
    %144 = vector.load %arg10[%c5, %c0_131, %c0_132] : memref<8x8x128xf32, #tpu.memory_space<vmem>>, vector<1x4x128xf32>
    %145 = vector.shape_cast %144 : vector<1x4x128xf32> to vector<4x128xf32>
    %c4_133 = arith.constant 4 : index
    %c0_134 = arith.constant 0 : index
    %146 = vector.load %arg9[%c4_133, %c0_134] : memref<16x128xf32, #tpu.memory_space<vmem>>, vector<4x128xf32>
    tpu.vector_store %arg9[%c4_133, %c0_134], %145 {strides = array<i32>} : memref<16x128xf32, #tpu.memory_space<vmem>>, vector<4x128xf32>,
    %147 = arith.extf %143 : vector<8x128xbf16> to vector<8x128xf32>
    %c8_135 = arith.constant 8 : index
    %c0_136 = arith.constant 0 : index
    %148 = vector.load %arg9[%c8_135, %c0_136] : memref<16x128xf32, #tpu.memory_space<vmem>>, vector<8x128xf32>
    tpu.vector_store %arg9[%c8_135, %c0_136], %147 {strides = array<i32>} : memref<16x128xf32, #tpu.memory_space<vmem>>, vector<8x128xf32>,
    %c12_137 = arith.constant 12 : index
    %c0_138 = arith.constant 0 : index
    %149 = vector.load %arg9[%c12_137, %c0_138] : memref<16x128xf32, #tpu.memory_space<vmem>>, vector<4x128xf32>
    %c5_139 = arith.constant 5 : index
    %c0_140 = arith.constant 0 : index
    %c0_141 = arith.constant 0 : index
    %150 = vector.load %arg10[%c5_139, %c0_140, %c0_141] : memref<8x8x128xf32, #tpu.memory_space<vmem>>, vector<1x4x128xf32>
    %151 = vector.shape_cast %150 : vector<1x4x128xf32> to vector<4x128xf32>
    %152 = vector.shape_cast %149 : vector<4x128xf32> to vector<1x4x128xf32>
    tpu.vector_store %arg10[%c5_139, %c0_140, %c0_141], %152 {strides = array<i32>} : memref<8x8x128xf32, #tpu.memory_space<vmem>>, vector<1x4x128xf32>,
    %c4_142 = arith.constant 4 : index
    %c0_143 = arith.constant 0 : index
    %153 = vector.load %arg9[%c4_142, %c0_143] : memref<16x128xf32, #tpu.memory_space<vmem>>, vector<8x128xf32>
    %154 = arith.truncf %153 : vector<8x128xf32> to vector<8x128xbf16>
    %c5_144 = arith.constant 5 : index
    %c0_145 = arith.constant 0 : index
    %c0_146 = arith.constant 0 : index
    %155 = vector.load %arg3[%c5_144, %c0_145, %c0_146] : memref<8x128x128xbf16, #tpu.memory_space<vmem>>, vector<1x128x128xbf16>
    %156 = vector.shape_cast %155 : vector<1x128x128xbf16> to vector<128x128xbf16>
    %cst_147 = arith.constant dense<0.000000e+00> : vector<8x128xf32>
    %157 = tpu.matmul %154, %156, %cst_147 {dimension_numbers = #tpu.dot_dimension_numbers<[1], [0], [0], [1], [0, 0, 1, 1], [], []>} : vector<8x128xbf16>, vector<128x128xbf16>, vector<8x128xf32> -> vector<8x128xf32>
    %c5_148 = arith.constant 5 : index
    %c0_149 = arith.constant 0 : index
    %c0_150 = arith.constant 0 : index
    %158 = vector.load %arg4[%c5_148, %c0_149, %c0_150] : memref<8x128x128xbf16, #tpu.memory_space<vmem>>, vector<1x128x128xbf16>
    %159 = vector.shape_cast %158 : vector<1x128x128xbf16> to vector<128x128xbf16>
    %cst_151 = arith.constant dense<0.000000e+00> : vector<8x128xf32>
    %160 = tpu.matmul %143, %159, %cst_151 {dimension_numbers = #tpu.dot_dimension_numbers<[1], [0], [0], [1], [0, 0, 1, 1], [], []>} : vector<8x128xbf16>, vector<128x128xbf16>, vector<8x128xf32> -> vector<8x128xf32>
    %161 = arith.addf %157, %160 : vector<8x128xf32>
    %c5_152 = arith.constant 5 : index
    %c0_153 = arith.constant 0 : index
    %c0_154 = arith.constant 0 : index
    %162 = vector.load %arg5[%c5_152, %c0_153, %c0_154] : memref<8x1x128xf32, #tpu.memory_space<vmem>>, vector<1x1x128xf32>
    %163 = vector.shape_cast %162 : vector<1x1x128xf32> to vector<1x128xf32>
    %164 = vector.broadcast %163 : vector<1x128xf32> to vector<8x128xf32>
    %165 = arith.addf %161, %164 : vector<8x128xf32>
    %cst_155 = arith.constant 0.000000e+00 : f32
    %166 = vector.broadcast %cst_155 : f32 to vector<8x128xf32>
    %167 = arith.maximumf %165, %166 : vector<8x128xf32>
    %168 = arith.extf %118 : vector<8x128xbf16> to vector<8x128xf32>
    %169 = arith.addf %167, %168 : vector<8x128xf32>
    %cst_156 = arith.constant 0.000000e+00 : f32
    %170 = vector.broadcast %cst_156 : f32 to vector<8x128xf32>
    %171 = arith.maximumf %169, %170 : vector<8x128xf32>
    %172 = arith.truncf %171 : vector<8x128xf32> to vector<8x128xbf16>
    %c6_157 = arith.constant 6 : index
    %c0_158 = arith.constant 0 : index
    %c0_159 = arith.constant 0 : index
    %173 = vector.load %arg10[%c6_157, %c0_158, %c0_159] : memref<8x8x128xf32, #tpu.memory_space<vmem>>, vector<1x8x128xf32>
    %174 = vector.shape_cast %173 : vector<1x8x128xf32> to vector<8x128xf32>
    %c0_160 = arith.constant 0 : index
    %c0_161 = arith.constant 0 : index
    %175 = vector.load %arg9[%c0_160, %c0_161] : memref<16x128xf32, #tpu.memory_space<vmem>>, vector<8x128xf32>
    tpu.vector_store %arg9[%c0_160, %c0_161], %174 {strides = array<i32>} : memref<16x128xf32, #tpu.memory_space<vmem>>, vector<8x128xf32>,
    %176 = arith.extf %172 : vector<8x128xbf16> to vector<8x128xf32>
    %c8_162 = arith.constant 8 : index
    %c0_163 = arith.constant 0 : index
    %177 = vector.load %arg9[%c8_162, %c0_163] : memref<16x128xf32, #tpu.memory_space<vmem>>, vector<8x128xf32>
    tpu.vector_store %arg9[%c8_162, %c0_163], %176 {strides = array<i32>} : memref<16x128xf32, #tpu.memory_space<vmem>>, vector<8x128xf32>,
    %c8_164 = arith.constant 8 : index
    %c0_165 = arith.constant 0 : index
    %178 = vector.load %arg9[%c8_164, %c0_165] : memref<16x128xf32, #tpu.memory_space<vmem>>, vector<8x128xf32>
    %c6_166 = arith.constant 6 : index
    %c0_167 = arith.constant 0 : index
    %c0_168 = arith.constant 0 : index
    %179 = vector.load %arg10[%c6_166, %c0_167, %c0_168] : memref<8x8x128xf32, #tpu.memory_space<vmem>>, vector<1x8x128xf32>
    %180 = vector.shape_cast %179 : vector<1x8x128xf32> to vector<8x128xf32>
    %181 = vector.shape_cast %178 : vector<8x128xf32> to vector<1x8x128xf32>
    tpu.vector_store %arg10[%c6_166, %c0_167, %c0_168], %181 {strides = array<i32>} : memref<8x8x128xf32, #tpu.memory_space<vmem>>, vector<1x8x128xf32>,
    %c0_169 = arith.constant 0 : index
    %c0_170 = arith.constant 0 : index
    %182 = vector.load %arg9[%c0_169, %c0_170] : memref<16x128xf32, #tpu.memory_space<vmem>>, vector<8x128xf32>
    %183 = arith.truncf %182 : vector<8x128xf32> to vector<8x128xbf16>
    %c6_171 = arith.constant 6 : index
    %c0_172 = arith.constant 0 : index
    %c0_173 = arith.constant 0 : index
    %184 = vector.load %arg3[%c6_171, %c0_172, %c0_173] : memref<8x128x128xbf16, #tpu.memory_space<vmem>>, vector<1x128x128xbf16>
    %185 = vector.shape_cast %184 : vector<1x128x128xbf16> to vector<128x128xbf16>
    %cst_174 = arith.constant dense<0.000000e+00> : vector<8x128xf32>
    %186 = tpu.matmul %183, %185, %cst_174 {dimension_numbers = #tpu.dot_dimension_numbers<[1], [0], [0], [1], [0, 0, 1, 1], [], []>} : vector<8x128xbf16>, vector<128x128xbf16>, vector<8x128xf32> -> vector<8x128xf32>
    %c6_175 = arith.constant 6 : index
    %c0_176 = arith.constant 0 : index
    %c0_177 = arith.constant 0 : index
    %187 = vector.load %arg4[%c6_175, %c0_176, %c0_177] : memref<8x128x128xbf16, #tpu.memory_space<vmem>>, vector<1x128x128xbf16>
    %188 = vector.shape_cast %187 : vector<1x128x128xbf16> to vector<128x128xbf16>
    %cst_178 = arith.constant dense<0.000000e+00> : vector<8x128xf32>
    %189 = tpu.matmul %172, %188, %cst_178 {dimension_numbers = #tpu.dot_dimension_numbers<[1], [0], [0], [1], [0, 0, 1, 1], [], []>} : vector<8x128xbf16>, vector<128x128xbf16>, vector<8x128xf32> -> vector<8x128xf32>
    %190 = arith.addf %186, %189 : vector<8x128xf32>
    %c6_179 = arith.constant 6 : index
    %c0_180 = arith.constant 0 : index
    %c0_181 = arith.constant 0 : index
    %191 = vector.load %arg5[%c6_179, %c0_180, %c0_181] : memref<8x1x128xf32, #tpu.memory_space<vmem>>, vector<1x1x128xf32>
    %192 = vector.shape_cast %191 : vector<1x1x128xf32> to vector<1x128xf32>
    %193 = vector.broadcast %192 : vector<1x128xf32> to vector<8x128xf32>
    %194 = arith.addf %190, %193 : vector<8x128xf32>
    %cst_182 = arith.constant 0.000000e+00 : f32
    %195 = vector.broadcast %cst_182 : f32 to vector<8x128xf32>
    %196 = arith.maximumf %194, %195 : vector<8x128xf32>
    %197 = arith.truncf %196 : vector<8x128xf32> to vector<8x128xbf16>
    %c7_183 = arith.constant 7 : index
    %c0_184 = arith.constant 0 : index
    %c0_185 = arith.constant 0 : index
    %198 = vector.load %arg10[%c7_183, %c0_184, %c0_185] : memref<8x8x128xf32, #tpu.memory_space<vmem>>, vector<1x8x128xf32>
    %199 = vector.shape_cast %198 : vector<1x8x128xf32> to vector<8x128xf32>
    %c0_186 = arith.constant 0 : index
    %c0_187 = arith.constant 0 : index
    %200 = vector.load %arg9[%c0_186, %c0_187] : memref<16x128xf32, #tpu.memory_space<vmem>>, vector<8x128xf32>
    tpu.vector_store %arg9[%c0_186, %c0_187], %199 {strides = array<i32>} : memref<16x128xf32, #tpu.memory_space<vmem>>, vector<8x128xf32>,
    %201 = arith.extf %197 : vector<8x128xbf16> to vector<8x128xf32>
    %c8_188 = arith.constant 8 : index
    %c0_189 = arith.constant 0 : index
    %202 = vector.load %arg9[%c8_188, %c0_189] : memref<16x128xf32, #tpu.memory_space<vmem>>, vector<8x128xf32>
    tpu.vector_store %arg9[%c8_188, %c0_189], %201 {strides = array<i32>} : memref<16x128xf32, #tpu.memory_space<vmem>>, vector<8x128xf32>,
    %c8_190 = arith.constant 8 : index
    %c0_191 = arith.constant 0 : index
    %203 = vector.load %arg9[%c8_190, %c0_191] : memref<16x128xf32, #tpu.memory_space<vmem>>, vector<8x128xf32>
    %c7_192 = arith.constant 7 : index
    %c0_193 = arith.constant 0 : index
    %c0_194 = arith.constant 0 : index
    %204 = vector.load %arg10[%c7_192, %c0_193, %c0_194] : memref<8x8x128xf32, #tpu.memory_space<vmem>>, vector<1x8x128xf32>
    %205 = vector.shape_cast %204 : vector<1x8x128xf32> to vector<8x128xf32>
    %206 = vector.shape_cast %203 : vector<8x128xf32> to vector<1x8x128xf32>
    tpu.vector_store %arg10[%c7_192, %c0_193, %c0_194], %206 {strides = array<i32>} : memref<8x8x128xf32, #tpu.memory_space<vmem>>, vector<1x8x128xf32>,
    %c0_195 = arith.constant 0 : index
    %c0_196 = arith.constant 0 : index
    %207 = vector.load %arg9[%c0_195, %c0_196] : memref<16x128xf32, #tpu.memory_space<vmem>>, vector<8x128xf32>
    %208 = arith.truncf %207 : vector<8x128xf32> to vector<8x128xbf16>
    %c7_197 = arith.constant 7 : index
    %c0_198 = arith.constant 0 : index
    %c0_199 = arith.constant 0 : index
    %209 = vector.load %arg3[%c7_197, %c0_198, %c0_199] : memref<8x128x128xbf16, #tpu.memory_space<vmem>>, vector<1x128x128xbf16>
    %210 = vector.shape_cast %209 : vector<1x128x128xbf16> to vector<128x128xbf16>
    %cst_200 = arith.constant dense<0.000000e+00> : vector<8x128xf32>
    %211 = tpu.matmul %208, %210, %cst_200 {dimension_numbers = #tpu.dot_dimension_numbers<[1], [0], [0], [1], [0, 0, 1, 1], [], []>} : vector<8x128xbf16>, vector<128x128xbf16>, vector<8x128xf32> -> vector<8x128xf32>
    %c7_201 = arith.constant 7 : index
    %c0_202 = arith.constant 0 : index
    %c0_203 = arith.constant 0 : index
    %212 = vector.load %arg4[%c7_201, %c0_202, %c0_203] : memref<8x128x128xbf16, #tpu.memory_space<vmem>>, vector<1x128x128xbf16>
    %213 = vector.shape_cast %212 : vector<1x128x128xbf16> to vector<128x128xbf16>
    %cst_204 = arith.constant dense<0.000000e+00> : vector<8x128xf32>
    %214 = tpu.matmul %197, %213, %cst_204 {dimension_numbers = #tpu.dot_dimension_numbers<[1], [0], [0], [1], [0, 0, 1, 1], [], []>} : vector<8x128xbf16>, vector<128x128xbf16>, vector<8x128xf32> -> vector<8x128xf32>
    %215 = arith.addf %211, %214 : vector<8x128xf32>
    %c7_205 = arith.constant 7 : index
    %c0_206 = arith.constant 0 : index
    %c0_207 = arith.constant 0 : index
    %216 = vector.load %arg5[%c7_205, %c0_206, %c0_207] : memref<8x1x128xf32, #tpu.memory_space<vmem>>, vector<1x1x128xf32>
    %217 = vector.shape_cast %216 : vector<1x1x128xf32> to vector<1x128xf32>
    %218 = vector.broadcast %217 : vector<1x128xf32> to vector<8x128xf32>
    %219 = arith.addf %215, %218 : vector<8x128xf32>
    %cst_208 = arith.constant 0.000000e+00 : f32
    %220 = vector.broadcast %cst_208 : f32 to vector<8x128xf32>
    %221 = arith.maximumf %219, %220 : vector<8x128xf32>
    %c1_209 = arith.constant 1 : index
    %c0_210 = arith.constant 0 : index
    %c0_211 = arith.constant 0 : index
    %222 = vector.load %arg6[%c1_209, %c0_210, %c0_211] : memref<2x128x128xbf16, #tpu.memory_space<vmem>>, vector<1x128x128xbf16>
    %223 = vector.shape_cast %222 : vector<1x128x128xbf16> to vector<128x128xbf16>
    %cst_212 = arith.constant dense<0.000000e+00> : vector<8x128xf32>
    %224 = tpu.matmul %172, %223, %cst_212 {dimension_numbers = #tpu.dot_dimension_numbers<[1], [0], [0], [1], [0, 0, 1, 1], [], []>} : vector<8x128xbf16>, vector<128x128xbf16>, vector<8x128xf32> -> vector<8x128xf32>
    %c1_213 = arith.constant 1 : index
    %c0_214 = arith.constant 0 : index
    %c0_215 = arith.constant 0 : index
    %225 = vector.load %arg7[%c1_213, %c0_214, %c0_215] : memref<2x1x128xf32, #tpu.memory_space<vmem>>, vector<1x1x128xf32>
    %226 = vector.shape_cast %225 : vector<1x1x128xf32> to vector<1x128xf32>
    %227 = vector.broadcast %226 : vector<1x128xf32> to vector<8x128xf32>
    %228 = arith.addf %224, %227 : vector<8x128xf32>
    %229 = arith.addf %221, %228 : vector<8x128xf32>
    %cst_216 = arith.constant 0.000000e+00 : f32
    %230 = vector.broadcast %cst_216 : f32 to vector<8x128xf32>
    %231 = arith.maximumf %229, %230 : vector<8x128xf32>
    %c0_217 = arith.constant 0 : index
    %c0_218 = arith.constant 0 : index
    %c0_219 = arith.constant 0 : index
    %232 = vector.load %arg8[%c0_217, %c0_218, %c0_219] : memref<1x8x128xf32, #tpu.memory_space<vmem>>, vector<1x8x128xf32>
    %233 = vector.shape_cast %232 : vector<1x8x128xf32> to vector<8x128xf32>
    %234 = vector.shape_cast %231 : vector<8x128xf32> to vector<1x8x128xf32>
    tpu.vector_store %arg8[%c0_217, %c0_218, %c0_219], %234 {strides = array<i32>} : memref<1x8x128xf32, #tpu.memory_space<vmem>>, vector<1x8x128xf32>,
    return
  }
  func.func @transform_0(%arg0: i32, %arg1: i32) -> (i32, i32, i32) {
    %c0_i32 = arith.constant 0 : i32
    %c0_i32_0 = arith.constant 0 : i32
    return %arg0, %arg1, %c0_i32 : i32, i32, i32
  }
  func.func @transform_1(%arg0: i32, %arg1: i32) -> (i32, i32, i32) {
    %c0_i32 = arith.constant 0 : i32
    %c0_i32_0 = arith.constant 0 : i32
    %c0_i32_1 = arith.constant 0 : i32
    %c0_i32_2 = arith.constant 0 : i32
    return %c0_i32, %c0_i32_0, %c0_i32_1 : i32, i32, i32
  }
  func.func @transform_2(%arg0: i32, %arg1: i32) -> (i32, i32, i32) {
    %c0_i32 = arith.constant 0 : i32
    %c0_i32_0 = arith.constant 0 : i32
    %c0_i32_1 = arith.constant 0 : i32
    %c0_i32_2 = arith.constant 0 : i32
    return %c0_i32, %c0_i32_0, %c0_i32_1 : i32, i32, i32
  }
  func.func @transform_3(%arg0: i32, %arg1: i32) -> (i32, i32, i32) {
    %c0_i32 = arith.constant 0 : i32
    %c0_i32_0 = arith.constant 0 : i32
    %c0_i32_1 = arith.constant 0 : i32
    %c0_i32_2 = arith.constant 0 : i32
    return %c0_i32, %c0_i32_0, %c0_i32_1 : i32, i32, i32
  }
  func.func @transform_4(%arg0: i32, %arg1: i32) -> (i32, i32, i32) {
    %c0_i32 = arith.constant 0 : i32
    %c0_i32_0 = arith.constant 0 : i32
    %c0_i32_1 = arith.constant 0 : i32
    %c0_i32_2 = arith.constant 0 : i32
    return %c0_i32, %c0_i32_0, %c0_i32_1 : i32, i32, i32
  }
  func.func @transform_5(%arg0: i32, %arg1: i32) -> (i32, i32, i32) {
    %c0_i32 = arith.constant 0 : i32
    %c0_i32_0 = arith.constant 0 : i32
    %c0_i32_1 = arith.constant 0 : i32
    %c0_i32_2 = arith.constant 0 : i32
    return %c0_i32, %c0_i32_0, %c0_i32_1 : i32, i32, i32
  }
  func.func @transform_6(%arg0: i32, %arg1: i32) -> (i32, i32, i32) {
    %c0_i32 = arith.constant 0 : i32
    %c0_i32_0 = arith.constant 0 : i32
    return %arg0, %arg1, %c0_i32 : i32, i32, i32
  }
}

</mosaic_0001>

<bundles_post_ra>
// kernel: tpu_custom_call.1
= control target key start
LH: loop header
LB: loop body
LE: loop exit
PB: predicated region body
PF: predicated region fallthrough
CT: control target
= control target key end

     0   :  { %s3407_s0 = inlined_call_operand.hbm [shape: bf16[1,16,128], index: 0, kind: input, shape index: {}]   ;;  %s3408_s1 = inlined_call_operand.hbm [shape: bf16[8,128,128], index: 1, kind: input, shape index: {}]   ;;  %s3409_s2 = inlined_call_operand.hbm [shape: bf16[8,128,128], index: 2, kind: input, shape index: {}]   ;;  %s3410_s3 = inlined_call_operand.hbm [shape: f32[8,1,128], index: 3, kind: input, shape index: {}]   ;;  %s3411_s4 = inlined_call_operand.hbm [shape: bf16[2,128,128], index: 4, kind: input, shape index: {}]   ;;  %s3412_s5 = inlined_call_operand.vmem [shape: f32[2,1,128], index: 5, kind: input, shape index: {}]   ;;  %s3413_s6 = inlined_call_operand.hbm [shape: f32[1,16,128], index: 6, kind: output, shape index: {}]  }
   0x1   :  { %3414 = sst [smem:[#allocation18_spill]] %s3408_s1 }
   0x2   :  { %11 = vsyncpa [#allocation5], 0 }
   0x3   :  { %13 = vsyncpa [#allocation5 + $0x1], 0 }
   0x4   :  { %14 = vsyncpa [#allocation8], 0 }
   0x5   :  { %15 = vsyncpa [#allocation11], 0 }
   0x6   :  { %16 = vsyncpa [#allocation6], 0 }
   0x7   :  { %18 = vsyncpa [#allocation6 + $0x1], 0  ;;  %s3203_s21 = smov 0   ;;  %s3205_s22 = smov 0  }
   0x8   :  { %s3207_s23 = smov 0   ;;  %s3209_s24 = smov 0  }
   0x9   :  { %s3211_s25 = smov 0   ;;  %s3213_s26 = smov 0  }
   0xa LB: > { %s2056_s27 = sadd.s32 4294967295, %s3157_s26   ;;  %p2058_p0 = scmp.ge.s32.totalorder %s3157_s26, 1  ;;  %s3157_s26 = sphi %s3213_s26, %s24_s26   ;;  %s3153_s25 = sphi %s3211_s25, %s3426_s25   ;;  %s3149_s24 = sphi %s3209_s24, %s3425_s24   ;;  %s3145_s23 = sphi %s3207_s23, %s3424_s23   ;;  %s3141_s22 = sphi %s3205_s22, %s3423_s22   ;;  %s3137_s21 = sphi %s3203_s21, %s3422_s21  }
   0xb   : > { %p3237_p1 = scmp.eq.s32.totalorder %s2056_s27, 0  ;;  %p202_p2 = scmp.lt.s32.totalorder %s3157_s26, 3 }
   0xc   : > { %s3416_s1 = sld [smem:[#allocation18_spill]]  ;;  %s3159_s9 = smov [#allocation7]  }
   0xd   : > { %p3245_p3 = pnand %p2058_p0, %p202_p2  ;;  %s215_s10 = sshll.u32 %s3159_s9, 4  ;;  %s216_s10 = int_to_ptr.vmem [resolvable:$true] %s215_s10 }
   0xe   : > { %p2063_p6 = scmp.ge.s32.totalorder %s3157_s26, 2  ;;  %s241_s14 = sshll.u32 %s3410_s3, 4  ;;  %s242_s14 = int_to_ptr.hbm [resolvable:$true] %s241_s14 }
   0xf   : > { %p2819_p4 = pneg %p3245_p3  ;;  %s3160_s15 = smov 64  }
  0x10   : > { %s3161_s16 = smov 4   ;;  %s3162_s17 = smov [#allocation10]  }
  0x11   : > { %p3253_p5 = pnand %p2819_p4, %p3237_p1  ;;  %s243_s18 = sshll.u32 %s3162_s17, 4  ;;  %s244_s18 = int_to_ptr.vmem [resolvable:$true] %s243_s18 }
  0x12   : > { %s213_s7 = sshll.u32 %s3416_s1, 4  ;;  %s3163_s19 = smov 16   ;;  %s214_s7 = int_to_ptr.hbm [resolvable:$true] %s213_s7 }
  0x13   : > { %2822 = dma.hbm_to_vmem [thread:$0]  (!%p3253_p5), %s214_s7, 8192, %s216_s10, [#allocation8], %s3160_s15, %s3160_s15, %s3161_s16  }
  0x14   : > { %s3164_s20 = smov 1   ;;  %s227_s9 = sshll.u32 %s3409_s2, 4  ;;  %s228_s9 = int_to_ptr.hbm [resolvable:$true] %s227_s9 }
  0x15   : > { %2828 = dma.hbm_to_vmem [thread:$0]  (!%p3253_p5), %s242_s14, 128, %s244_s18, [#allocation11], %s3163_s19, %s3163_s19, %s3164_s20  }
  0x16   : > { %s3165_s12 = smov [#allocation9]   ;;  %s255_s17 = sshll.u32 %s3411_s4, 4  ;;  %s256_s17 = int_to_ptr.hbm [resolvable:$true] %s255_s17 }
  0x17   : > { %s229_s7 = sshll.u32 %s3165_s12, 4  ;;  %s3166_s14 = smov [#allocation12]   ;;  %s230_s7 = int_to_ptr.vmem [resolvable:$true] %s229_s7 }
  0x18   : > { %2825 = dma.hbm_to_vmem [thread:$0]  (!%p3253_p5), %s228_s9, 8192, %s230_s7, [#allocation8], %s3160_s15, %s3160_s15, %s3161_s16  }
  0x19   : > { %s257_s18 = sshll.u32 %s3166_s14, 4  ;;  %s33_s19 = sadd.s32 1, %s3153_s25  ;;  %s258_s18 = int_to_ptr.vmem [resolvable:$true] %s257_s18 }
  0x1a   : > { %2831 = dma.hbm_to_vmem [thread:$0]  (!%p3253_p5), %s256_s17, 2048, %s258_s18, [#allocation11], %s3160_s15, %s3160_s15, %s3161_s16  }
  0x1b   : > { %s2057_s20 = sadd.s32 4294967294, %s3157_s26   ;;  %p34_p7 = scmp.ge.s32.totalorder %s33_s19, 2 }
  0x1c   : > { %s45_s29 = sadd.s32 1, %s3145_s23  ;;  %p52_p8 = scmp.ne.s32.totalorder %s3145_s23, %s3141_s22 }
  0x1d   : > { %s3428_s19 = smov (%p34_p7, %s33_s19), 0  ;;  %p53_p9 = scmp.eq.s32.totalorder %s3157_s26, 0 }
  0x1e   : > { %p58_p10 = scmp.ne.s32.totalorder %s3141_s22, %s3137_s21  ;;  %s41_s30 = ssub.s32 %s3153_s25, %s3428_s19 }
  0x1f   : > { %p189_p11 = scmp.eq.s32.totalorder %s2056_s27, 1  ;;  %p43_p12 = scmp.eq.s32.totalorder %s41_s30, 0 }
  0x20   : > { %p3291_p13 = por %p3237_p1, %p58_p10  ;;  %p195_p2 = scmp.eq.s32.totalorder %s2057_s20, 1 }
  0x21   : > { %p3295_p0 = por %p189_p11, %p52_p8  ;;  %p54_p4 = por %p53_p9, %p52_p8 }
  0x22   : > { %s3300_s16 = scalar_select %p43_p12, %s3145_s23, %s45_s29  }
  0x23   : > { %p3302_p5 = por %p195_p2, %p58_p10  ;;  %s274_s12 = sand.u32 1, %s3145_s23  }
  0x24   : > { %s2065_s27 = sshll.u32 %s3153_s25, 2  ;;  %p2844_p7 = scmp.lt.s32.totalorder %s3157_s26, 2 }
  0x25   : > { %s2064_s7 = sshll.u32 %s274_s12, 2  ;;  %s284_s17 = scalar_lea.hbm %s3407_s0, %s2065_s27 }
  0x26   : > { %s286_s14 = sshll.u32 %s284_s17, 4  ;;  %s278_s18 = scalar_lea.vmem [#allocation4], %s2064_s7  ;;  %s287_s14 = int_to_ptr.hbm [resolvable:$true] %s286_s14 }
  0x27   : > { %s288_s30 = sshll.u32 %s278_s18, 4  ;;  %p2833_p11 = pnand %p2844_p7, %p54_p4  ;;  %s289_s30 = int_to_ptr.vmem [resolvable:$true] %s288_s30 }
  0x28   : > { %s275_s20 = scalar_lea.sflag [#allocation5], %s274_s12  ;;  %297 = sbr.rel (%p3245_p3) target bundleno = 1272 (0x4f8), region = 44 }
  0x29   : > { %2835 = dma.hbm_to_vmem [thread:$0]  (!%p2833_p11), %s287_s14, 64, %s289_s30, %s275_s20  }
  0x2a   : > { %s3315_s29 = sand.u32 (!%p3245_p3), 1, %s3141_s22  }
  0x2b   : > { %s2067_s1 = sshll.u32 (!%p3245_p3), %s3315_s29, 2  ;;  %s300_s10 = scalar_lea.sflag (!%p3245_p3), [#allocation5], %s3315_s29 }
  0x2c   : > { %s303_s27 = scalar_lea.vmem (!%p3245_p3), [#allocation4], %s2067_s1 }
  0x2d   : > { %3120 = dma.done.wait (%p3291_p13), %s300_s10, 64  }
  0x2e   : > { %3122 = vsyncadd (%p3291_p13), %s300_s10, 4294967232 }
  0x2f   : > { %3124 = dma.done.wait (%p3237_p1), [#allocation8], 16384  }
  0x30   : > { %3126 = vsyncadd (%p3237_p1), [#allocation8], 4294950912 }
  0x31   : > { %3128 = dma.done.wait (%p3237_p1), [#allocation11], 2176  }
  0x32   : > { %3130 = vsyncadd (%p3237_p1), [#allocation11], 4294965120  ;;  %s2072_s8 = sshll.u32 %s3315_s29, 3  ;;  %p2073_p3 = scmp.ne.s32.totalorder %s3149_s24, 0 }
  0x33   : > { %s3332_s1 = scalar_lea.vmem [#allocation13], %s2072_s8 }
  0x34   : > { %356 = sbr.rel (%p2073_p3) target bundleno = 66 (0x42), region = 68 }
  0x39   : > { %v3167_v0 = vmov 0.0  }
  0x3a   : > { %357 = vst [vmem:[#allocation3 + $0x30] sm:$0xff] %v3167_v0 }
  0x3b   : > { %358 = vst [vmem:[#allocation3] sm:$0xff] %v3167_v0 }
  0x3c   : > { %359 = vst [vmem:[#allocation3 + $0x18] sm:$0xff] %v3167_v0 }
  0x3d   : > { %360 = vst [vmem:[#allocation3 + $0x10] sm:$0xff] %v3167_v0 }
  0x3e   : > { %361 = vst [vmem:[#allocation3 + $0x8] sm:$0xff] %v3167_v0 }
  0x3f   : > { %362 = vst [vmem:[#allocation3 + $0x20] sm:$0xff] %v3167_v0 }
  0x40   : > { %363 = vst [vmem:[#allocation3 + $0x28] sm:$0xff] %v3167_v0 }
  0x41   : > { %364 = vst [vmem:[#allocation3 + $0x38] sm:$0xff] %v3167_v0 }
  0x42 PF: > { %v2670_v1 = vld [vmem:[#allocation9 + $0x38] sm:$0xff]  ;;  %v2669_v3 = vld [vmem:[#allocation9 + $0x30] sm:$0xff]  ;;  %v366_v6 = vld [vmem:[#allocation3 + $0x30] sm:$0x1]  ;;  %s2652_s12 = sshll.u32 %s3149_s24, 3  ;;  %s1933_s30 = sshll.u32 %s3332_s1, 4  ;;  %s1934_s30 = int_to_ptr.vmem [resolvable:$true] %s1933_s30 }
  0x43   : > { %v2662_v2 = vld [vmem:[#allocation7 + $0x38] sm:$0xff]  ;;  %454 = vmatpush.bf16.msra.mxu0 %v2670_v1  ;;  %v2661_v4 = vld [vmem:[#allocation7 + $0x30] sm:$0xff]  ;;  %v2668_v7 = vld [vmem:[#allocation9 + $0x28] sm:$0xff]  ;;  %367 = vst [vmem:[#allocation2 + $0x7] sm:$0x1] %v366_v6  ;;  %s1931_s18 = scalar_lea.hbm %s3413_s6, %s2652_s12  ;;  %s1919_s24 = scalar_lea.sflag [#allocation6], %s3315_s29 }
  0x44   : > { %515 = vmatpush.bf16.msra.mxu1 %v2662_v2  ;;  %v3335_v5 = vld [vmem:[%s303_s27] sm:$0xf]  ;;  %v2660_v8 = vld [vmem:[#allocation7 + $0x28] sm:$0xff]  ;;  %v2685_v12 = vld [vmem:[#allocation9 + $0x70] sm:$0xff]  ;;  %s1935_s20 = sshll.u32 %s1931_s18, 4  ;;  %s3087_s11 = scalar_lea.hbm %s3413_s6, 16  ;;  %s1936_s20 = int_to_ptr.hbm [resolvable:$true] %s1935_s20 }
  0x45   : > { %v368_v9 = vunpack.c.l.bf16 %v3335_v5  ;;  %v2686_v10 = vld [vmem:[#allocation9 + $0x78] sm:$0xff]  ;;  %v2667_v13 = vld [vmem:[#allocation9 + $0x20] sm:$0xff]  ;;  %v2677_v15 = vld [vmem:[#allocation7 + $0x70] sm:$0xff]  ;;  %s3081_s10 = sshra.s32 %s1936_s20, 4  ;;  %s3082_s10 = int_to_ptr.hbm [resolvable:$true] %s3081_s10 }
  0x46   : > { %v2678_v11 = vld [vmem:[#allocation7 + $0x78] sm:$0xff]  ;;  %626 = vmatpush.bf16.msra.mxu2 %v2686_v10  ;;  %v2659_v14 = vld [vmem:[#allocation7 + $0x20] sm:$0xff]  ;;  %v2684_v16 = vld [vmem:[#allocation9 + $0x68] sm:$0xff]  ;;  %s3083_s27 = scalar_lea.hbm %s3082_s10, 8  ;;  %p3088_p10 = scmp.lt.s32.totalorder %s3082_s10, %s3413_s6 }
  0x47   : > { %455 = vmatpush.bf16.msra.mxu0 %v2669_v3  ;;  %369 = vst [vmem:[#allocation2 + $0x8] sm:$0xff] %v368_v9  ;;  %687 = vmatpush.bf16.msra.mxu3 %v2678_v11  ;;  %v536_v17 = vld [vmem:[#allocation3] sm:$0x1]  ;;  %v2676_v18 = vld [vmem:[#allocation7 + $0x68] sm:$0xff]  ;;  %v2683_v22 = vld [vmem:[#allocation9 + $0x60] sm:$0xff]  ;;  %p3084_p1 = scmp.ne.s32.totalorder %s3082_s10, %s3083_s27  ;;  %p3089_p12 = scmp.lt.s32.totalorder %s3087_s11, %s3083_s27 }
  0x48   : > { %516 = vmatpush.bf16.msra.mxu1 %v2661_v4  ;;  %v2666_v19 = vld [vmem:[#allocation9 + $0x18] sm:$0xff]  ;;  %v2665_v23 = vld [vmem:[#allocation9 + $0x10] sm:$0xff]  ;;  %v2664_v26 = vld [vmem:[#allocation9 + $0x8] sm:$0xff] }
  0x49   : > { %v2658_v20 = vld [vmem:[#allocation7 + $0x18] sm:$0xff]  ;;  %v2657_v24 = vld [vmem:[#allocation7 + $0x10] sm:$0xff]  ;;  %v2656_v27 = vld [vmem:[#allocation7 + $0x8] sm:$0xff]  ;;  %p3085_p8 = pnand %p3084_p1, %p3295_p0  ;;  %p3090_p13 = por %p3089_p12, %p3088_p10 }
  0x4a   : > { %627 = vmatpush.bf16.msra.mxu2 %v2685_v12  ;;  %v2682_v25 = vld [vmem:[#allocation9 + $0x58] sm:$0xff]  ;;  %v2681_v28 = vld [vmem:[#allocation9 + $0x50] sm:$0xff]  ;;  %v2663_v29 = vld [vmem:[#allocation9] sm:$0xff] }
  0x4b   : > { %456 = vmatpush.bf16.msra.mxu0 %v2668_v7  ;;  %688 = vmatpush.bf16.msra.mxu3 %v2677_v15  ;;  %v2655_v30 = vld [vmem:[#allocation7] sm:$0xff]  ;;  %v2693_v33 = vld [vmem:[#allocation12 + $0x30] sm:$0xff]  ;;  %v2692_v34 = vld [vmem:[#allocation12 + $0x28] sm:$0xff]  ;;  %p3086_p9 = pneg %p3085_p8 }
  0x4c   : > { %517 = vmatpush.bf16.msra.mxu1 %v2660_v8  ;;  %v2694_v31 = vld [vmem:[#allocation12 + $0x38] sm:$0xff]  ;;  %v2680_v35 = vld [vmem:[#allocation9 + $0x48] sm:$0xff]  ;;  %v2674_v39 = vld [vmem:[#allocation7 + $0x58] sm:$0xff] }
  0x4d   : > { %v2675_v36 = vld [vmem:[#allocation7 + $0x60] sm:$0xff]  ;;  %v2691_v37 = vld [vmem:[#allocation12 + $0x20] sm:$0xff]  ;;  %v2673_v42 = vld [vmem:[#allocation7 + $0x50] sm:$0xff]  ;;  %p3091_p2 = pnand %p3090_p13, %p3086_p9 }
  0x4e   : > { %v372_v21 = vld [vmem:[#allocation2 + $0x7] sm:$0xff]  ;;  %628 = vmatpush.bf16.msra.mxu2 %v2684_v16  ;;  %v2679_v38 = vld [vmem:[#allocation9 + $0x40] sm:$0xff]  ;;  %v370_v41 = vld [vmem:[#allocation2 + $0xf] sm:$0x1] }
  0x4f   : > { %457 = vmatpush.bf16.msra.mxu0 %v2667_v13  ;;  %537 = vst [vmem:[#allocation2 + $0x7] sm:$0x1] %v536_v17  ;;  %689 = vmatpush.bf16.msra.mxu3 %v2676_v18  ;;  %v373_v32 = vpack.c.bf16 %v372_v21, %v372_v21  ;;  %v2690_v40 = vld [vmem:[#allocation12 + $0x18] sm:$0xff]  ;;  %v2689_v43 = vld [vmem:[#allocation12 + $0x10] sm:$0xff]  ;;  %v2672_v44 = vld [vmem:[#allocation7 + $0x48] sm:$0xff] }
  0x50   : > { %518 = vmatpush.bf16.msra.mxu1 %v2659_v14  ;;  %371 = vst [vmem:[#allocation3 + $0x30] sm:$0x1] %v370_v41  ;;  %v2688_v45 = vld [vmem:[#allocation12 + $0x8] sm:$0xff]  ;;  %v2671_v46 = vld [vmem:[#allocation7 + $0x40] sm:$0xff]  ;;  %v2687_v47 = vld [vmem:[#allocation12] sm:$0xff] }
  0x51   : > { %v2710_v48 = vld [vmem:[#allocation9 + $0xb8] sm:$0xff]  ;;  %v2709_v49 = vld [vmem:[#allocation9 + $0xb0] sm:$0xff]  ;;  %v2907_v50 = vld [vmem:[#allocation10] ss:$0 sm:$0xff] }
  0x52   : > { %629 = vmatpush.bf16.msra.mxu2 %v2683_v22  ;;  %v2708_v63 = vld [vmem:[#allocation9 + $0xa8] sm:$0xff]  ;;  %v2702_v0 = vld [vmem:[#allocation7 + $0xb8] sm:$0xff]  ;;  %v2707_v1 = vld [vmem:[#allocation9 + $0xa0] sm:$0xff] }
  0x53   : > { %458 = vmatpush.bf16.msra.mxu0 %v2666_v19  ;;  %690 = vmatpush.bf16.msra.mxu3 %v2675_v36  ;;  %v2706_v3 = vld [vmem:[#allocation9 + $0x98] sm:$0xff]  ;;  %v2701_v4 = vld [vmem:[#allocation7 + $0xb0] sm:$0xff]  ;;  %v2700_v6 = vld [vmem:[#allocation7 + $0xa8] sm:$0xff] }
  0x54   : > { %519 = vmatpush.bf16.msra.mxu1 %v2658_v20  ;;  %v2704_v8 = vld [vmem:[#allocation9 + $0x88] sm:$0xff]  ;;  %v2699_v9 = vld [vmem:[#allocation7 + $0xa0] sm:$0xff]  ;;  %v2698_v11 = vld [vmem:[#allocation7 + $0x98] sm:$0xff] }
  0x55   : > { %v2703_v10 = vld [vmem:[#allocation9 + $0x80] sm:$0xff]  ;;  %v2697_v12 = vld [vmem:[#allocation7 + $0x90] sm:$0xff]  ;;  %v2696_v14 = vld [vmem:[#allocation7 + $0x88] sm:$0xff] }
  0x56   : > { %630 = vmatpush.bf16.msra.mxu2 %v2682_v25  ;;  %v792_v13 = vld [vmem:[#allocation3 + $0x18] sm:$0x3]  ;;  %v2695_v15 = vld [vmem:[#allocation7 + $0x80] sm:$0xff]  ;;  %v2726_v17 = vld [vmem:[#allocation9 + $0xf8] sm:$0xff] }
  0x57   : > { %459 = vmatpush.bf16.msra.mxu0 %v2665_v23  ;;  %691 = vmatpush.bf16.msra.mxu3 %v2674_v39  ;;  %v2908_v19 = vld [vmem:[%s3412_s5] ss:$0 sm:$0xff]  ;;  %v2909_v20 = vld [vmem:[#allocation10 + $0x1] ss:$0 sm:$0xff]  ;;  %v2717_v39 = vld [vmem:[#allocation7 + $0xf0] sm:$0xff] }
  0x58   : > { %520 = vmatpush.bf16.msra.mxu1 %v2657_v24  ;;  %v2723_v36 = vld [vmem:[#allocation9 + $0xe0] sm:$0xff]  ;;  %v2716_v41 = vld [vmem:[#allocation7 + $0xe8] sm:$0xff] }
  0x5a   : > { %631 = vmatpush.bf16.msra.mxu2 %v2681_v28 }
  0x5b   : > { %460 = vmatpush.bf16.msra.mxu0 %v2664_v26  ;;  %692 = vmatpush.bf16.msra.mxu3 %v2673_v42  ;;  %v2720_v42 = vld [vmem:[#allocation9 + $0xc8] sm:$0xff] }
  0x5c   : > { %521 = vmatpush.bf16.msra.mxu1 %v2656_v27 }
  0x5e   : > { %632 = vmatpush.bf16.msra.mxu2 %v2680_v35  ;;  %v2724_v35 = vld [vmem:[#allocation9 + $0xe8] sm:$0xff] }
  0x5f   : > { %461 = vmatpush.bf16.msra.mxu0 %v2663_v29  ;;  %693 = vmatpush.bf16.msra.mxu3 %v2672_v44  ;;  %v2719_v44 = vld [vmem:[#allocation9 + $0xc0] sm:$0xff] }
  0x60   : > { %522 = vmatpush.bf16.msra.mxu1 %v2655_v30 }
  0x62   : > { %462 = vmatmul.bf16.vlgmr.msra.gmra.mxu0 %v3335_v5  ;;  %633 = vmatpush.bf16.msra.mxu2 %v2679_v38  ;;  %v2722_v38 = vld [vmem:[#allocation9 + $0xd8] sm:$0xff] }
  0x63   : > { %775 = vmatpush.bf16.msrb.mxu0 %v2694_v31  ;;  %523 = vmatmul.bf16.vlgmr.msra.gmra.mxu1 %v373_v32 }
  0x64   : > { %694 = vmatpush.bf16.msra.mxu3 %v2671_v46  ;;  %882 = vmatpush.bf16.msrb.mxu1 %v2710_v48  ;;  %v2713_v46 = vld [vmem:[#allocation7 + $0xd0] sm:$0xff]  ;;  %v2712_v48 = vld [vmem:[#allocation7 + $0xc8] sm:$0xff] }
  0x66   : > { %943 = vmatpush.bf16.msrb.mxu2 %v2702_v0 }
  0x67   : > { %776 = vmatpush.bf16.msrb.mxu0 %v2693_v33 }
  0x68   : > { %883 = vmatpush.bf16.msrb.mxu1 %v2709_v49  ;;  %1055 = vmatpush.bf16.msrb.mxu3 %v2726_v17 }
  0x6a   : > { %944 = vmatpush.bf16.msrb.mxu2 %v2701_v4  ;;  %v2738_v4 = vld [vmem:[#allocation9 + $0x118] sm:$0xff] }
  0x6b   : > { %777 = vmatpush.bf16.msrb.mxu0 %v2692_v34  ;;  %v2725_v34 = vld [vmem:[#allocation9 + $0xf0] sm:$0xff] }
  0x6c   : > { %884 = vmatpush.bf16.msrb.mxu1 %v2708_v63  ;;  %1056 = vmatpush.bf16.msrb.mxu3 %v2725_v34 }
  0x6e   : > { %945 = vmatpush.bf16.msrb.mxu2 %v2700_v6  ;;  %v2737_v6 = vld [vmem:[#allocation9 + $0x110] sm:$0xff] }
  0x6f   : > { %778 = vmatpush.bf16.msrb.mxu0 %v2691_v37  ;;  %v2718_v37 = vld [vmem:[#allocation7 + $0xf8] sm:$0xff] }
  0x70   : > { %885 = vmatpush.bf16.msrb.mxu1 %v2707_v1  ;;  %1057 = vmatpush.bf16.msrb.mxu3 %v2724_v35  ;;  %v2755_v35 = vld [vmem:[#allocation9 + $0x160] sm:$0xff] }
  0x72   : > { %946 = vmatpush.bf16.msrb.mxu2 %v2699_v9  ;;  %v2731_v9 = vld [vmem:[#allocation7 + $0x120] sm:$0xff] }
  0x73   : > { %779 = vmatpush.bf16.msrb.mxu0 %v2690_v40  ;;  %v2721_v40 = vld [vmem:[#allocation9 + $0xd0] sm:$0xff] }
  0x74   : > { %886 = vmatpush.bf16.msrb.mxu1 %v2706_v3  ;;  %1058 = vmatpush.bf16.msrb.mxu3 %v2723_v36  ;;  %v2734_v3 = vld [vmem:[#allocation7 + $0x138] sm:$0xff] }
  0x75   : > { %v2750_v36 = vld [vmem:[#allocation7 + $0x178] sm:$0xff] }
  0x76   : > { %947 = vmatpush.bf16.msrb.mxu2 %v2698_v11  ;;  %v2730_v11 = vld [vmem:[#allocation7 + $0x118] sm:$0xff] }
  0x77   : > { %780 = vmatpush.bf16.msrb.mxu0 %v2689_v43  ;;  %v2715_v43 = vld [vmem:[#allocation7 + $0xe0] sm:$0xff] }
  0x78   : > { %1059 = vmatpush.bf16.msrb.mxu3 %v2722_v38  ;;  %v2749_v38 = vld [vmem:[#allocation7 + $0x170] sm:$0xff] }
  0x7a   : > { %948 = vmatpush.bf16.msrb.mxu2 %v2697_v12  ;;  %v2729_v12 = vld [vmem:[#allocation7 + $0x110] sm:$0xff] }
  0x7b   : > { %781 = vmatpush.bf16.msrb.mxu0 %v2688_v45  ;;  %v2714_v45 = vld [vmem:[#allocation7 + $0xd8] sm:$0xff] }
  0x7c   : > { %1060 = vmatpush.bf16.msrb.mxu3 %v2721_v40  ;;  %v2748_v40 = vld [vmem:[#allocation7 + $0x168] sm:$0xff] }
  0x7e   : > { %949 = vmatpush.bf16.msrb.mxu2 %v2696_v14  ;;  %v2728_v14 = vld [vmem:[#allocation7 + $0x108] sm:$0xff] }
  0x7f   : > { %782 = vmatpush.bf16.msrb.mxu0 %v2687_v47  ;;  %v965_v47 = vld [vmem:[#allocation3 + $0x10] sm:$0x3] }
  0x80   : > { %1061 = vmatpush.bf16.msrb.mxu3 %v2720_v42  ;;  %v2747_v42 = vld [vmem:[#allocation7 + $0x160] sm:$0xff] }
  0x82   : > { %783 = vmatmul.bf16.vlgmr.msrb.gmra.mxu0 %v3335_v5  ;;  %v2705_v5 = vld [vmem:[#allocation9 + $0x90] sm:$0xff]  ;;  %950 = vmatpush.bf16.msrb.mxu2 %v2695_v15  ;;  %v2727_v15 = vld [vmem:[#allocation7 + $0x100] sm:$0xff] }
  0x83   : > { %887 = vmatpush.bf16.msrb.mxu1 %v2705_v5  ;;  %1116 = vmatpush.bf16.msra.mxu0 %v2718_v37  ;;  %v2733_v5 = vld [vmem:[#allocation7 + $0x130] sm:$0xff]  ;;  %v2754_v37 = vld [vmem:[#allocation9 + $0x158] sm:$0xff] }
  0x84   : > { %1062 = vmatpush.bf16.msrb.mxu3 %v2719_v44  ;;  %v2746_v44 = vld [vmem:[#allocation7 + $0x158] sm:$0xff] }
  0x87   : > { %888 = vmatpush.bf16.msrb.mxu1 %v2704_v8  ;;  %1117 = vmatpush.bf16.msra.mxu0 %v2717_v39  ;;  %v2736_v8 = vld [vmem:[#allocation9 + $0x108] sm:$0xff]  ;;  %v2753_v39 = vld [vmem:[#allocation9 + $0x150] sm:$0xff] }
  0x8b   : > { %889 = vmatpush.bf16.msrb.mxu1 %v2703_v10  ;;  %1118 = vmatpush.bf16.msra.mxu0 %v2716_v41  ;;  %v2735_v10 = vld [vmem:[#allocation9 + $0x100] sm:$0xff]  ;;  %v2752_v41 = vld [vmem:[#allocation9 + $0x148] sm:$0xff] }
  0x8f   : > { %1119 = vmatpush.bf16.msra.mxu0 %v2715_v43  ;;  %v2751_v43 = vld [vmem:[#allocation9 + $0x140] sm:$0xff] }
  0x93   : > { %1120 = vmatpush.bf16.msra.mxu0 %v2714_v45  ;;  %v2745_v45 = vld [vmem:[#allocation7 + $0x150] sm:$0xff] }
  0x97   : > { %1121 = vmatpush.bf16.msra.mxu0 %v2713_v46  ;;  %v2744_v46 = vld [vmem:[#allocation7 + $0x148] sm:$0xff] }
  0x9b   : > { %1122 = vmatpush.bf16.msra.mxu0 %v2712_v48  ;;  %v2743_v48 = vld [vmem:[#allocation7 + $0x140] sm:$0xff] }
  0xdf   : > { %v463_v51 = vpop.f32.mrf.mxu0 }
  0xe0   : > { %v524_v52 = vpop.f32.mrf.mxu1 }
  0xe1   : > { %v525_v53 = vadd.f32 %v524_v52, %v463_v51  ;;  %v2742_v51 = vld [vmem:[#allocation9 + $0x138] sm:$0xff] }
  0xe2   : > { %1230 = vmatpush.bf16.msra.mxu1 %v2742_v51 }
  0xe3   : > { %v532_v54 = vadd.f32 %v2907_v50, %v525_v53  ;;  %v2711_v50 = vld [vmem:[#allocation7 + $0xc0] sm:$0xff]  ;;  %v2741_v53 = vld [vmem:[#allocation9 + $0x130] sm:$0xff] }
  0xe4   : > { %1123 = vmatpush.bf16.msra.mxu0 %v2711_v50  ;;  %v2774_v50 = vld [vmem:[#allocation9 + $0x1b8] sm:$0xff] }
  0xe5   : > { %v533_v55 = vmax.f32 %v532_v54, 0.0  ;;  %v2740_v54 = vld [vmem:[#allocation9 + $0x128] sm:$0xff] }
  0xe6   : > { %1231 = vmatpush.bf16.msra.mxu1 %v2741_v53  ;;  %v2773_v53 = vld [vmem:[#allocation9 + $0x1b0] sm:$0xff] }
  0xe7   : > { %v534_v56 = vpack.c.bf16 %v533_v55, %v533_v55  ;;  %v465_v57 = vpop.f32.mrf.mxu0  ;;  %v2910_v55 = vld [vmem:[#allocation10 + $0x2] ss:$0 sm:$0xff] }
  0xe8   : > { %v526_v58 = vpop.f32.mrf.mxu1  ;;  %1464 = vmatpush.bf16.msrb.mxu0 %v2750_v36  ;;  %v2780_v36 = vld [vmem:[#allocation7 + $0x1e8] sm:$0xff] }
  0xe9   : > { %v538_v59 = vunpack.c.l.bf16 %v534_v56  ;;  %634 = vmatmul.bf16.vlgmr.msra.gmra.mxu2 %v534_v56 }
  0xea   : > { %1232 = vmatpush.bf16.msra.mxu1 %v2740_v54  ;;  %1291 = vmatpush.bf16.msra.mxu2 %v2734_v3  ;;  %v2764_v54 = vld [vmem:[#allocation7 + $0x1a8] sm:$0xff]  ;;  %v2769_v3 = vld [vmem:[#allocation9 + $0x190] sm:$0xff] }
  0xeb   : > { %539 = vst [vmem:[#allocation2 + $0x8] sm:$0xff] %v538_v59 }
  0xec   : > { %1465 = vmatpush.bf16.msrb.mxu0 %v2749_v38 }
  0xee   : > { %1292 = vmatpush.bf16.msra.mxu2 %v2733_v5 }
  0xf0   : > { %1466 = vmatpush.bf16.msrb.mxu0 %v2748_v40  ;;  %v2779_v40 = vld [vmem:[#allocation7 + $0x1e0] sm:$0xff] }
  0xf2   : > { %v542_v60 = vld [vmem:[#allocation2 + $0x7] sm:$0xff]  ;;  %v540_v61 = vld [vmem:[#allocation2 + $0xf] sm:$0x1] }
  0xf3   : > { %v543_v62 = vpack.c.bf16 %v542_v60, %v542_v60  ;;  %541 = vst [vmem:[#allocation3] sm:$0x1] %v540_v61 }
  0xf4   : > { %793 = vst [vmem:[#allocation2 + $0x6] sm:$0x3] %v792_v13  ;;  %v1140_v13 = vld [vmem:[#allocation3 + $0x8] sm:$0xf]  ;;  %1467 = vmatpush.bf16.msrb.mxu0 %v2747_v42 }
  0xf5   : > { %695 = vmatmul.bf16.vlgmr.msra.gmra.mxu3 %v543_v62 }
  0xf8   : > { %1468 = vmatpush.bf16.msrb.mxu0 %v2746_v44 }
  0xfc   : > { %1469 = vmatpush.bf16.msrb.mxu0 %v2745_v45 }
  0xff   : > { %v784_v2 = vpop.f32.mrf.mxu0 }
 0x100   : > { %v785_v23 = vadd.f32 %v2908_v19, %v784_v2  ;;  %v2739_v2 = vld [vmem:[#allocation9 + $0x120] sm:$0xff]  ;;  %1470 = vmatpush.bf16.msrb.mxu0 %v2744_v46  ;;  %v2778_v46 = vld [vmem:[#allocation7 + $0x1d8] sm:$0xff] }
 0x101   : > { %1233 = vmatpush.bf16.msra.mxu1 %v2739_v2  ;;  %v2761_v2 = vld [vmem:[#allocation7 + $0x190] sm:$0xff] }
 0x104   : > { %1471 = vmatpush.bf16.msrb.mxu0 %v2743_v48  ;;  %v2777_v48 = vld [vmem:[#allocation7 + $0x1d0] sm:$0xff] }
 0x105   : > { %1234 = vmatpush.bf16.msra.mxu1 %v2738_v4 }
 0x107   : > { %v786_v7 = vpop.f32.mrf.mxu0 }
 0x108   : > { %v2732_v7 = vld [vmem:[#allocation7 + $0x128] sm:$0xff] }
 0x109   : > { %1235 = vmatpush.bf16.msra.mxu1 %v2737_v6  ;;  %1293 = vmatpush.bf16.msra.mxu2 %v2732_v7  ;;  %v2760_v6 = vld [vmem:[#allocation7 + $0x188] sm:$0xff] }
 0x10a   : > { %v2768_v7 = vld [vmem:[#allocation9 + $0x188] sm:$0xff] }
 0x10d   : > { %1236 = vmatpush.bf16.msra.mxu1 %v2736_v8  ;;  %1294 = vmatpush.bf16.msra.mxu2 %v2731_v9 }
 0x111   : > { %1237 = vmatpush.bf16.msra.mxu1 %v2735_v10  ;;  %1295 = vmatpush.bf16.msra.mxu2 %v2730_v11  ;;  %v1488_v11 = vld [vmem:[#allocation3 + $0x28] sm:$0xff] }
 0x115   : > { %1296 = vmatpush.bf16.msra.mxu2 %v2729_v12  ;;  %v2759_v12 = vld [vmem:[#allocation7 + $0x180] sm:$0xff] }
 0x119   : > { %1297 = vmatpush.bf16.msra.mxu2 %v2728_v14  ;;  %v2798_v14 = vld [vmem:[#allocation12 + $0x78] sm:$0xff] }
 0x11d   : > { %1298 = vmatpush.bf16.msra.mxu2 %v2727_v15  ;;  %v1495_v15 = vpack.c.bf16 %v1488_v11, %v1488_v11 }
 0x16c   : > { %v635_v16 = vpop.f32.mrf.mxu2 }
 0x174   : > { %v637_v18 = vpop.f32.mrf.mxu2 }
 0x175   : > { %v2911_v18 = vld [vmem:[#allocation10 + $0x3] ss:$0 sm:$0xff] }
 0x178   : > { %v696_v21 = vpop.f32.mrf.mxu3 }
 0x179   : > { %v697_v22 = vadd.f32 %v696_v21, %v635_v16  ;;  %v2758_v16 = vld [vmem:[#allocation9 + $0x178] sm:$0xff] }
 0x17a   : > { %1403 = vmatpush.bf16.msra.mxu3 %v2758_v16  ;;  %v3357_v16 = vld [vmem:[#allocation3 + $0x38] sm:$0xff] }
 0x17b   : > { %v705_v24 = vadd.f32 %v2909_v20, %v697_v22 }
 0x17d   : > { %v706_v25 = vmax.f32 %v705_v24, 0.0 }
 0x17f   : > { %v788_v26 = vadd.f32 %v785_v23, %v706_v25 }
 0x180   : > { %v698_v27 = vpop.f32.mrf.mxu3 }
 0x181   : > { %v789_v28 = vmax.f32 %v788_v26, 0.0 }
 0x183   : > { %v3343_v29 = vpack.c.bf16 %v789_v28, %v789_v28 }
 0x185   : > { %v794_v30 = vunpack.c.l.bf16 %v3343_v29  ;;  %890 = vmatmul.bf16.vlgmr.msrb.gmra.mxu1 %v3343_v29  ;;  %v2757_v29 = vld [vmem:[#allocation9 + $0x170] sm:$0xff] }
 0x186   : > { %1404 = vmatpush.bf16.msra.mxu3 %v2757_v29  ;;  %1578 = vmatpush.bf16.msrb.mxu1 %v2774_v50 }
 0x187   : > { %795 = vst [vmem:[#allocation2 + $0x8] sm:$0xff] %v794_v30 }
 0x18a   : > { %1579 = vmatpush.bf16.msrb.mxu1 %v2773_v53  ;;  %v2783_v53 = vld [vmem:[#allocation9 + $0x1c0] sm:$0xff] }
 0x18e   : > { %v798_v31 = vld [vmem:[#allocation2 + $0x6] sm:$0xff]  ;;  %v796_v32 = vld [vmem:[#allocation2 + $0xe] sm:$0x3] }
 0x18f   : > { %v799_v33 = vpack.c.bf16 %v798_v31, %v798_v31  ;;  %797 = vst [vmem:[#allocation3 + $0x18] sm:$0x3] %v796_v32  ;;  %v1313_v31 = vld [vmem:[#allocation3 + $0x20] sm:$0xf] }
 0x190   : > { %966 = vst [vmem:[#allocation2 + $0x6] sm:$0x3] %v965_v47 }
 0x191   : > { %951 = vmatmul.bf16.vlgmr.msrb.gmra.mxu2 %v799_v33 }
 0x202   : > { %v891_v49 = vpop.f32.mrf.mxu1 }
 0x20a   : > { %v893_v52 = vpop.f32.mrf.mxu1 }
 0x20b   : > { %v2765_v52 = vld [vmem:[#allocation7 + $0x1b0] sm:$0xff] }
 0x214   : > { %v952_v56 = vpop.f32.mrf.mxu2 }
 0x215   : > { %v953_v57 = vadd.f32 %v952_v56, %v891_v49  ;;  %v2766_v49 = vld [vmem:[#allocation7 + $0x1b8] sm:$0xff]  ;;  %v2912_v56 = vld [vmem:[#allocation10 + $0x4] ss:$0 sm:$0xff] }
 0x216   : > { %1639 = vmatpush.bf16.msrb.mxu2 %v2766_v49  ;;  %v2776_v49 = vld [vmem:[#allocation7 + $0x1c8] sm:$0xff] }
 0x217   : > { %v961_v58 = vadd.f32 %v2910_v55, %v953_v57  ;;  %v2772_v55 = vld [vmem:[#allocation9 + $0x1a8] sm:$0xff]  ;;  %v2763_v57 = vld [vmem:[#allocation7 + $0x1a0] sm:$0xff] }
 0x218   : > { %1580 = vmatpush.bf16.msrb.mxu1 %v2772_v55  ;;  %v2914_v55 = vld [vmem:[#allocation10 + $0x6] ss:$0 sm:$0xff] }
 0x219   : > { %v962_v59 = vmax.f32 %v961_v58, 0.0  ;;  %v2771_v58 = vld [vmem:[#allocation9 + $0x1a0] sm:$0xff] }
 0x21a   : > { %1640 = vmatpush.bf16.msrb.mxu2 %v2765_v52  ;;  %v2775_v52 = vld [vmem:[#allocation7 + $0x1c0] sm:$0xff] }
 0x21b   : > { %v963_v60 = vpack.c.bf16 %v962_v59, %v962_v59 }
 0x21c   : > { %v954_v61 = vpop.f32.mrf.mxu2  ;;  %1581 = vmatpush.bf16.msrb.mxu1 %v2771_v58 }
 0x21d   : > { %v967_v62 = vunpack.c.l.bf16 %v963_v60  ;;  %1063 = vmatmul.bf16.vlgmr.msrb.gmra.mxu3 %v963_v60 }
 0x21e   : > { %1641 = vmatpush.bf16.msrb.mxu2 %v2764_v54  ;;  %v1668_v54 = vpack.c.bf16 %v3357_v16, %v3357_v16 }
 0x21f   : > { %968 = vst [vmem:[#allocation2 + $0x8] sm:$0xff] %v967_v62  ;;  %v2762_v62 = vld [vmem:[#allocation7 + $0x198] sm:$0xff] }
 0x222   : > { %1642 = vmatpush.bf16.msrb.mxu2 %v2763_v57 }
 0x226   : > { %v969_v63 = vld [vmem:[#allocation2 + $0xe] sm:$0x3]  ;;  %v971_v0 = vld [vmem:[#allocation2 + $0x6] sm:$0xff]  ;;  %1643 = vmatpush.bf16.msrb.mxu2 %v2762_v62 }
 0x227   : > { %970 = vst [vmem:[#allocation3 + $0x10] sm:$0x3] %v969_v63  ;;  %v972_v1 = vpack.c.bf16 %v971_v0, %v971_v0  ;;  %v2770_v63 = vld [vmem:[#allocation9 + $0x198] sm:$0xff] }
 0x228   : > { %1141 = vst [vmem:[#allocation2 + $0x4] sm:$0xf] %v1140_v13  ;;  %1582 = vmatpush.bf16.msrb.mxu1 %v2770_v63  ;;  %v2767_v13 = vld [vmem:[#allocation9 + $0x180] sm:$0xff] }
 0x229   : > { %1124 = vmatmul.bf16.vlgmr.msra.gmra.mxu0 %v972_v1 }
 0x22a   : > { %1644 = vmatpush.bf16.msrb.mxu2 %v2761_v2 }
 0x22c   : > { %1583 = vmatpush.bf16.msrb.mxu1 %v2769_v3  ;;  %v2916_v3 = vld [vmem:[#allocation10 + $0x7] ss:$0 sm:$0xff] }
 0x22e   : > { %1645 = vmatpush.bf16.msrb.mxu2 %v2760_v6 }
 0x230   : > { %1584 = vmatpush.bf16.msrb.mxu1 %v2768_v7 }
 0x232   : > { %1646 = vmatpush.bf16.msrb.mxu2 %v2759_v12 }
 0x234   : > { %1585 = vmatpush.bf16.msrb.mxu1 %v2767_v13 }
 0x2a0   : > { %v1064_v17 = vpop.f32.mrf.mxu3 }
 0x2a6   : > { %v1125_v19 = vpop.f32.mrf.mxu0 }
 0x2a7   : > { %v1126_v20 = vadd.f32 %v1125_v19, %v1064_v17  ;;  %v2797_v17 = vld [vmem:[#allocation12 + $0x70] sm:$0xff]  ;;  %v2795_v19 = vld [vmem:[#allocation12 + $0x60] sm:$0xff] }
 0x2a8   : > { %v1066_v21 = vpop.f32.mrf.mxu3 }
 0x2a9   : > { %v1134_v22 = vadd.f32 %v2911_v18, %v1126_v20  ;;  %v2796_v18 = vld [vmem:[#allocation12 + $0x68] sm:$0xff]  ;;  %v2794_v20 = vld [vmem:[#allocation12 + $0x58] sm:$0xff]  ;;  %v2793_v21 = vld [vmem:[#allocation12 + $0x50] sm:$0xff] }
 0x2ab   : > { %v1135_v23 = vmax.f32 %v1134_v22, 0.0  ;;  %v2792_v22 = vld [vmem:[#allocation12 + $0x48] sm:$0xff] }
 0x2ad   : > { %v1136_v24 = vadd.f32 %v1135_v23, %v794_v30  ;;  %v2756_v30 = vld [vmem:[#allocation9 + $0x168] sm:$0xff] }
 0x2ae   : > { %v1127_v25 = vpop.f32.mrf.mxu0  ;;  %1405 = vmatpush.bf16.msra.mxu3 %v2756_v30  ;;  %v2791_v23 = vld [vmem:[#allocation12 + $0x40] sm:$0xff] }
 0x2af   : > { %v1137_v26 = vmax.f32 %v1136_v24, 0.0  ;;  %v2782_v25 = vld [vmem:[#allocation7 + $0x1f8] sm:$0xff] }
 0x2b0   : > { %1812 = vmatpush.bf16.msra.mxu0 %v2782_v25 }
 0x2b1   : > { %v3351_v27 = vpack.c.bf16 %v1137_v26, %v1137_v26  ;;  %v2790_v26 = vld [vmem:[#allocation9 + $0x1f8] sm:$0xff] }
 0x2b2   : > { %1406 = vmatpush.bf16.msra.mxu3 %v2755_v35 }
 0x2b3   : > { %v1142_v28 = vunpack.c.l.bf16 %v3351_v27  ;;  %1238 = vmatmul.bf16.vlgmr.msra.gmra.mxu1 %v3351_v27  ;;  %v2785_v27 = vld [vmem:[#allocation9 + $0x1d0] sm:$0xff] }
 0x2b4   : > { %1902 = vmatpush.bf16.msra.mxu1 %v2798_v14 }
 0x2b5   : > { %1143 = vst [vmem:[#allocation2 + $0x8] sm:$0xff] %v1142_v28 }
 0x2b6   : > { %1407 = vmatpush.bf16.msra.mxu3 %v2754_v37  ;;  %v2788_v37 = vld [vmem:[#allocation9 + $0x1e8] sm:$0xff] }
 0x2b8   : > { %1903 = vmatpush.bf16.msra.mxu1 %v2797_v17 }
 0x2ba   : > { %1408 = vmatpush.bf16.msra.mxu3 %v2753_v39 }
 0x2bc   : > { %v1144_v32 = vld [vmem:[#allocation2 + $0xc] sm:$0xf]  ;;  %v1146_v33 = vld [vmem:[#allocation2 + $0x4] sm:$0xff]  ;;  %1904 = vmatpush.bf16.msra.mxu1 %v2796_v18 }
 0x2bd   : > { %1145 = vst [vmem:[#allocation3 + $0x8] sm:$0xf] %v1144_v32  ;;  %v1147_v34 = vpack.c.bf16 %v1146_v33, %v1146_v33  ;;  %v2781_v32 = vld [vmem:[#allocation7 + $0x1f0] sm:$0xff] }
 0x2be   : > { %1314 = vst [vmem:[#allocation2 + $0x4] sm:$0xf] %v1313_v31  ;;  %1409 = vmatpush.bf16.msra.mxu3 %v2752_v41  ;;  %v2913_v31 = vld [vmem:[#allocation10 + $0x5] ss:$0 sm:$0xff]  ;;  %v2789_v33 = vld [vmem:[#allocation9 + $0x1f0] sm:$0xff]  ;;  %1813 = vmatpush.bf16.msra.mxu0 %v2781_v32 }
 0x2bf   : > { %1299 = vmatmul.bf16.vlgmr.msra.gmra.mxu2 %v1147_v34  ;;  %v2787_v41 = vld [vmem:[#allocation9 + $0x1e0] sm:$0xff] }
 0x2c0   : > { %1905 = vmatpush.bf16.msra.mxu1 %v2795_v19 }
 0x2c2   : > { %1410 = vmatpush.bf16.msra.mxu3 %v2751_v43  ;;  %1814 = vmatpush.bf16.msra.mxu0 %v2780_v36 }
 0x2c4   : > { %1906 = vmatpush.bf16.msra.mxu1 %v2794_v20 }
 0x2c6   : > { %1751 = vmatpush.bf16.msrb.mxu3 %v2790_v26  ;;  %1815 = vmatpush.bf16.msra.mxu0 %v2779_v40 }
 0x2c8   : > { %1907 = vmatpush.bf16.msra.mxu1 %v2793_v21 }
 0x2ca   : > { %1752 = vmatpush.bf16.msrb.mxu3 %v2789_v33  ;;  %1816 = vmatpush.bf16.msra.mxu0 %v2778_v46 }
 0x2cc   : > { %1908 = vmatpush.bf16.msra.mxu1 %v2792_v22 }
 0x2ce   : > { %1753 = vmatpush.bf16.msrb.mxu3 %v2788_v37  ;;  %1817 = vmatpush.bf16.msra.mxu0 %v2777_v48 }
 0x2cf   : > { %1647 = vmatmul.bf16.vlgmr.msrb.gmra.mxu2 %v1495_v15 }
 0x2d0   : > { %1909 = vmatpush.bf16.msra.mxu1 %v2791_v23 }
 0x2d2   : > { %1754 = vmatpush.bf16.msrb.mxu3 %v2787_v41  ;;  %1818 = vmatpush.bf16.msra.mxu0 %v2776_v49 }
 0x2d6   : > { %1819 = vmatpush.bf16.msra.mxu0 %v2775_v52 }
 0x330   : > { %v1239_v47 = vpop.f32.mrf.mxu1 }
 0x338   : > { %v1241_v51 = vpop.f32.mrf.mxu1 }
 0x339   : > { %v2784_v51 = vld [vmem:[#allocation9 + $0x1c8] sm:$0xff] }
 0x342   : > { %v1300_v59 = vpop.f32.mrf.mxu2 }
 0x343   : > { %v1301_v60 = vadd.f32 %v1300_v59, %v1239_v47  ;;  %v2786_v47 = vld [vmem:[#allocation9 + $0x1d8] sm:$0xff] }
 0x344   : > { %1755 = vmatpush.bf16.msrb.mxu3 %v2786_v47 }
 0x345   : > { %v1309_v61 = vadd.f32 %v2912_v56, %v1301_v60 }
 0x347   : > { %v1310_v0 = vmax.f32 %v1309_v61, 0.0 }
 0x348   : > { %1756 = vmatpush.bf16.msrb.mxu3 %v2785_v27 }
 0x349   : > { %v1311_v1 = vpack.c.bf16 %v1310_v0, %v1310_v0 }
 0x34a   : > { %v1302_v4 = vpop.f32.mrf.mxu2 }
 0x34b   : > { %v1315_v5 = vunpack.c.l.bf16 %v1311_v1  ;;  %1411 = vmatmul.bf16.vlgmr.msra.gmra.mxu3 %v1311_v1 }
 0x34c   : > { %1757 = vmatpush.bf16.msrb.mxu3 %v2784_v51 }
 0x34d   : > { %1316 = vst [vmem:[#allocation2 + $0x8] sm:$0xff] %v1315_v5  ;;  %v2915_v5 = vld [vmem:[%s3412_s5 + $0x1] ss:$0 sm:$0xff] }
 0x350   : > { %1758 = vmatpush.bf16.msrb.mxu3 %v2783_v53 }
 0x354   : > { %v1317_v8 = vld [vmem:[#allocation2 + $0xc] sm:$0xf]  ;;  %v1319_v9 = vld [vmem:[#allocation2 + $0x4] sm:$0xff] }
 0x355   : > { %1318 = vst [vmem:[#allocation3 + $0x20] sm:$0xf] %v1317_v8  ;;  %v1320_v10 = vpack.c.bf16 %v1319_v9, %v1319_v9 }
 0x356   : > { %1662 = vst [vmem:[#allocation2] sm:$0xff] %v3357_v16 }
 0x357   : > { %1472 = vmatmul.bf16.vlgmr.msrb.gmra.mxu0 %v1320_v10 }
 0x367   : > { %1820 = vmatmul.bf16.vlgmr.msra.gmra.mxu0 %v1668_v54 }
 0x3ce   : > { %v1412_v24 = vpop.f32.mrf.mxu3 }
 0x3d4   : > { %v1473_v34 = vpop.f32.mrf.mxu0 }
 0x3d5   : > { %v1474_v29 = vadd.f32 %v1473_v34, %v1412_v24 }
 0x3d6   : > { %v1414_v30 = vpop.f32.mrf.mxu3 }
 0x3d7   : > { %v1482_v35 = vadd.f32 %v2913_v31, %v1474_v29 }
 0x3d9   : > { %v1483_v38 = vmax.f32 %v1482_v35, 0.0 }
 0x3db   : > { %v1484_v39 = vadd.f32 %v1483_v38, %v1142_v28  ;;  %v1648_v28 = vpop.f32.mrf.mxu2 }
 0x3dc   : > { %v1475_v42 = vpop.f32.mrf.mxu0 }
 0x3dd   : > { %v1485_v43 = vmax.f32 %v1484_v39, 0.0 }
 0x3df   : > { %v1486_v44 = vpack.c.bf16 %v1485_v43, %v1485_v43 }
 0x3e1   : > { %v1490_v45 = vunpack.c.l.bf16 %v1486_v44  ;;  %1586 = vmatmul.bf16.vlgmr.msrb.gmra.mxu1 %v1486_v44 }
 0x3e3   : > { %1493 = vst [vmem:[#allocation3 + $0x28] sm:$0xff] %v1490_v45  ;;  %v1650_v50 = vpop.f32.mrf.mxu2 }
 0x3e4   : > { %v1821_v1 = vpop.f32.mrf.mxu0 }
 0x3ec   : > { %v1823_v2 = vpop.f32.mrf.mxu0 }
 0x3f1   : > { %1910 = vmatmul.bf16.vlgmr.msra.gmra.mxu1 %v1486_v44 }
 0x45e   : > { %v1587_v56 = vpop.f32.mrf.mxu1 }
 0x45f   : > { %v1649_v57 = vadd.f32 %v1648_v28, %v1587_v56 }
 0x461   : > { %v1657_v58 = vadd.f32 %v2914_v55, %v1649_v57 }
 0x463   : > { %v1658_v59 = vmax.f32 %v1657_v58, 0.0 }
 0x465   : > { %v1659_v60 = vpack.c.bf16 %v1658_v59, %v1658_v59 }
 0x466   : > { %v1589_v61 = vpop.f32.mrf.mxu1 }
 0x467   : > { %v1663_v62 = vunpack.c.l.bf16 %v1659_v60  ;;  %1759 = vmatmul.bf16.vlgmr.msrb.gmra.mxu3 %v1659_v60 }
 0x469   : > { %1664 = vst [vmem:[#allocation2 + $0x8] sm:$0xff] %v1663_v62 }
 0x46a   : > { %1666 = vst [vmem:[#allocation3 + $0x38] sm:$0xff] %v1663_v62 }
 0x46e   : > { %v1911_v63 = vpop.f32.mrf.mxu1 }
 0x46f   : > { %v1912_v8 = vadd.f32 %v2915_v5, %v1911_v63 }
 0x476   : > { %v1913_v0 = vpop.f32.mrf.mxu1 }
 0x4ea   : > { %v1760_v4 = vpop.f32.mrf.mxu3 }
 0x4eb   : > { %v1822_v6 = vadd.f32 %v1821_v1, %v1760_v4 }
 0x4ed   : > { %v1830_v7 = vadd.f32 %v2916_v3, %v1822_v6 }
 0x4ef   : > { %v1831_v9 = vmax.f32 %v1830_v7, 0.0 }
 0x4f1   : > { %v1915_v10 = vadd.f32 %v1912_v8, %v1831_v9 }
 0x4f2   : > { %v1762_v11 = vpop.f32.mrf.mxu3 }
 0x4f3   : > { %v1916_v12 = vmax.f32 %v1915_v10, 0.0 }
 0x4f5   : > { %1917 = vst [vmem:[%s3332_s1] sm:$0xff] %v1916_v12 }
 0x4f6   : > { %3094 = shalt.err (!%p3091_p2)
}
 0x4f7   : > { %2817 = dma.vmem_to_hbm [thread:$0]  (%p3295_p0), %s1934_s30, 128, %s1936_s20, %s1919_s24  }
 0x4f8 PF: > { %s1947_s29 = sand.u32 1, %s3137_s21   ;;  %p2837_p4 = pnand %p2063_p6, %p3302_p5 }
 0x4f9   : > { %s1948_s1 = scalar_lea.sflag [#allocation6], %s1947_s29 }
 0x4fa   : > { %p2838_p7 = pneg %p2837_p4 }
 0x4fc   : > { %3132 = dma.done.wait (%p2838_p7), %s1948_s1, 128  }
 0x4fd   : > { %3134 = vsyncadd (%p2838_p7), %s1948_s1, 4294967168  ;;  %s24_s26 = sadd.s32 1, %s3157_s26   ;;  %s3422_s21 = smov %s3141_s22 }
 0x4fe   : > { %p21_p11 = scmp.ge.s32.totalorder %s24_s26, 4   ;;  %s3423_s22 = smov %s3145_s23 }
 0x4ff   : > { %s3424_s23 = smov %s3300_s16  ;;  %s3425_s24 = smov %s3153_s25 }
 0x500   : > { %s3426_s25 = smov %s3428_s19  ;;  %23 = sbr.rel (!%p21_p11) target bundleno = 10 (0xa), region = 139 }
 0x505   :  { %1954 = vsyncpa [#allocation5], 1 }
 0x506   :  { %1956 = vsyncpa [#allocation5 + $0x1], 1 }
 0x507   :  { %1957 = vsyncpa [#allocation8], 1 }
 0x508   :  { %1958 = vsyncpa [#allocation11], 1 }
 0x509   :  { %1959 = vsyncpa [#allocation6], 1 }
 0x50a   :  { %1961 = vsyncpa [#allocation6 + $0x1], 1 }

</bundles_post_ra>
